<compile_context>
chip_gen: v7x
topology: tpu7x:2x2x1
jax: 0.10.0
libtpu: 0.0.40
codegen_flags: <defaults>
</compile_context>

<pallas_src>
import functools

import jax
import jax.numpy as jnp
import numpy as np
from jax.experimental import pallas as pl
from jax.experimental.pallas import tpu as pltpu


def _conv3x3_im2col_kernel(x_ref, w_ref, b_ref, o_ref, *, H, Wp, Cin):
    # x_ref: (1, L, Cin)      bf16, flattened zero-padded image, L = (H+3)*Wp
    # w_ref: (9*Cin, CC)      bf16, im2col-ordered conv weight
    # b_ref: (1, CC)          f32
    # o_ref: (1, H*Wp, CC)    f32  (rows with w >= W are junk; wrapper drops them)
    rows = H * Wp

    # 9 contiguous (static-offset) sublane slices -> one (rows, 9*Cin) patch matrix.
    taps = []
    for ky in range(3):
        for kx in range(3):
            off = ky * Wp + kx
            taps.append(x_ref[0, off:off + rows, :])          # (rows, Cin)
    patches = jnp.concatenate(taps, axis=1)                    # (rows, 9*Cin) bf16

    # Single MXU pass: K = 9*Cin, N = Cout*r^2 (=128 in the demo -> lane-dense).
    acc = jnp.dot(patches, w_ref[...],
                  preferred_element_type=jnp.float32)          # (rows, CC) f32

    o_ref[...] = (acc + b_ref[...])[None, :, :]


def pixel_shuffle_block(x, weight, bias, upscale_factor):
    """x: (N, Cin, H, W) f32; weight: (Cout*r^2, Cin, 3, 3) OIHW; bias: (Cout*r^2,)."""
    r = upscale_factor
    N, Cin, H, W = x.shape
    CC = weight.shape[0]
    Cout = CC // (r * r)
    Wp = W + 2
    L = (H + 3) * Wp          # 1-px pad on top/left/right, 2 extra rows at the bottom
    rows = H * Wp             # so every flat tap slice [off, off+rows) stays in bounds

    # ---- wrapper-side layout plumbing (NCHW -> padded, flattened NHWC, bf16) ----
    x_nhwc = jnp.transpose(x, (0, 2, 3, 1))                            # (N, H, W, Cin)
    xpad = jnp.pad(x_nhwc, ((0, 0), (1, 2), (1, 1), (0, 0)))           # (N, H+3, W+2, Cin)
    xflat = xpad.reshape(N, L, Cin).astype(jnp.bfloat16)

    # OIHW -> (ky, kx, ci, co) -> (9*Cin, CC); row order matches the tap concat order.
    wmat = jnp.transpose(weight, (2, 3, 1, 0)).reshape(9 * Cin, CC).astype(jnp.bfloat16)
    bvec = bias.reshape(1, CC).astype(jnp.float32)

    kernel = functools.partial(_conv3x3_im2col_kernel, H=H, Wp=Wp, Cin=Cin)

    conv_flat = pl.pallas_call(
        kernel,
        out_shape=jax.ShapeDtypeStruct((N, rows, CC), jnp.float32),
        grid_spec=pltpu.PrefetchScalarGridSpec(
            num_scalar_prefetch=0,
            grid=(N,),
            in_specs=[
                pl.BlockSpec((1, L, Cin), lambda n: (n, 0, 0)),        # image
                pl.BlockSpec((9 * Cin, CC), lambda n: (0, 0)),         # weight
                pl.BlockSpec((1, CC), lambda n: (0, 0)),               # bias
            ],
            out_specs=pl.BlockSpec((1, rows, CC), lambda n: (n, 0, 0)),
        ),
        compiler_params=pltpu.CompilerParams(
            dimension_semantics=("parallel",)),
    )(xflat, wmat, bvec)

    # ---- drop W-padding junk columns, then PixelShuffle + NCHW (pure layout) ----
    conv = conv_flat.reshape(N, H, Wp, CC)[:, :, :W, :]                # (N, H, W, CC)
    y = conv.reshape(N, H, W, Cout, r, r)                              # ch = c*r*r + i*r + j
    y = jnp.transpose(y, (0, 3, 1, 4, 2, 5))                           # (N, C, H, i, W, j)
    return y.reshape(N, Cout, H * r, W * r)


def _reference(x, weight, bias, r):
    y = jax.lax.conv_general_dilated(
        x, weight, (1, 1), ((1, 1), (1, 1)),
        dimension_numbers=("NCHW", "OIHW", "NCHW"))
    y = y + bias[None, :, None, None]
    N, CC, H, W = y.shape
    C = CC // (r * r)
    y = y.reshape(N, C, r, r, H, W)
    y = jnp.transpose(y, (0, 1, 4, 2, 5, 3))
    return y.reshape(N, C, H * r, W * r)


if __name__ == "__main__":
    # in_channel=32, out_channel=32, upscale_factor=2  => conv out channels = 128
    # (exactly one lane width, so the kernel's stores are fully lane-dense).
    N, Cin, H, W = 2, 32, 16, 16
    Cout, r, K = 32, 2, 3
    CC = Cout * r * r

    key = jax.random.PRNGKey(0)
    kx_, kw, kb = jax.random.split(key, 3)

    x = jax.random.normal(kx_, (N, Cin, H, W), dtype=jnp.float32)
    bound = 1.0 / np.sqrt(Cin * K * K)                 # kaiming-uniform-like init
    w = jax.random.uniform(kw, (CC, Cin, K, K), jnp.float32, -bound, bound)
    b = jax.random.uniform(kb, (CC,), jnp.float32, -bound, bound)

    out = pixel_shuffle_block(x, w, b, r)
    out = jax.block_until_ready(out)

    ref = _reference(x, w, b, r)
    # bf16 MXU operands with f32 accumulation -> tolerance loosened vs pure f32.
    np.testing.assert_allclose(np.asarray(out), np.asarray(ref), rtol=2e-2, atol=3e-2)

    print("KERNEL_OK")
</pallas_src>

<mosaic_0001>
module attributes {stable_mosaic.version = 11 : i64} {
  func.func @_conv3x3_im2col_kernel(%arg0: i32, %arg1: memref<1x342x32xbf16, #tpu.memory_space<vmem>>, %arg2: memref<288x128xbf16, #tpu.memory_space<vmem>>, %arg3: memref<1x128xf32, #tpu.memory_space<vmem>>, %arg4: memref<1x288x128xf32, #tpu.memory_space<vmem>>) attributes {dimension_semantics = [#tpu.dimension_semantics<parallel>], iteration_bounds = array<i64: 2>, scalar_prefetch = 0 : i64, scratch_operands = 0 : i64, tpu.core_type = #tpu.core_type<tc>, window_params = [{transform_indices = @transform_0, window_bounds = array<i64: 1, 342, 32>}, {pipeline_mode = #tpu.pipeline_mode<synchronous>, transform_indices = @transform_1, window_bounds = array<i64: 288, 128>}, {pipeline_mode = #tpu.pipeline_mode<synchronous>, transform_indices = @transform_2, window_bounds = array<i64: 1, 128>}, {transform_indices = @transform_3, window_bounds = array<i64: 1, 288, 128>}]} {
    %c0 = arith.constant 0 : index
    %c0_0 = arith.constant 0 : index
    %c0_1 = arith.constant 0 : index
    %0 = vector.load %arg1[%c0, %c0_0, %c0_1] : memref<1x342x32xbf16, #tpu.memory_space<vmem>>, vector<1x288x32xbf16>
    %1 = vector.shape_cast %0 : vector<1x288x32xbf16> to vector<288x32xbf16>
    %c0_2 = arith.constant 0 : index
    %c1 = arith.constant 1 : index
    %c0_3 = arith.constant 0 : index
    %2 = vector.load %arg1[%c0_2, %c1, %c0_3] : memref<1x342x32xbf16, #tpu.memory_space<vmem>>, vector<1x288x32xbf16>
    %3 = vector.shape_cast %2 : vector<1x288x32xbf16> to vector<288x32xbf16>
    %c0_4 = arith.constant 0 : index
    %c2 = arith.constant 2 : index
    %c0_5 = arith.constant 0 : index
    %4 = vector.load %arg1[%c0_4, %c2, %c0_5] : memref<1x342x32xbf16, #tpu.memory_space<vmem>>, vector<1x288x32xbf16>
    %5 = vector.shape_cast %4 : vector<1x288x32xbf16> to vector<288x32xbf16>
    %c0_6 = arith.constant 0 : index
    %c18 = arith.constant 18 : index
    %c0_7 = arith.constant 0 : index
    %6 = vector.load %arg1[%c0_6, %c18, %c0_7] : memref<1x342x32xbf16, #tpu.memory_space<vmem>>, vector<1x288x32xbf16>
    %7 = vector.shape_cast %6 : vector<1x288x32xbf16> to vector<288x32xbf16>
    %c0_8 = arith.constant 0 : index
    %c19 = arith.constant 19 : index
    %c0_9 = arith.constant 0 : index
    %8 = vector.load %arg1[%c0_8, %c19, %c0_9] : memref<1x342x32xbf16, #tpu.memory_space<vmem>>, vector<1x288x32xbf16>
    %9 = vector.shape_cast %8 : vector<1x288x32xbf16> to vector<288x32xbf16>
    %c0_10 = arith.constant 0 : index
    %c20 = arith.constant 20 : index
    %c0_11 = arith.constant 0 : index
    %10 = vector.load %arg1[%c0_10, %c20, %c0_11] : memref<1x342x32xbf16, #tpu.memory_space<vmem>>, vector<1x288x32xbf16>
    %11 = vector.shape_cast %10 : vector<1x288x32xbf16> to vector<288x32xbf16>
    %c0_12 = arith.constant 0 : index
    %c36 = arith.constant 36 : index
    %c0_13 = arith.constant 0 : index
    %12 = vector.load %arg1[%c0_12, %c36, %c0_13] : memref<1x342x32xbf16, #tpu.memory_space<vmem>>, vector<1x288x32xbf16>
    %13 = vector.shape_cast %12 : vector<1x288x32xbf16> to vector<288x32xbf16>
    %c0_14 = arith.constant 0 : index
    %c37 = arith.constant 37 : index
    %c0_15 = arith.constant 0 : index
    %14 = vector.load %arg1[%c0_14, %c37, %c0_15] : memref<1x342x32xbf16, #tpu.memory_space<vmem>>, vector<1x288x32xbf16>
    %15 = vector.shape_cast %14 : vector<1x288x32xbf16> to vector<288x32xbf16>
    %c0_16 = arith.constant 0 : index
    %c38 = arith.constant 38 : index
    %c0_17 = arith.constant 0 : index
    %16 = vector.load %arg1[%c0_16, %c38, %c0_17] : memref<1x342x32xbf16, #tpu.memory_space<vmem>>, vector<1x288x32xbf16>
    %17 = vector.shape_cast %16 : vector<1x288x32xbf16> to vector<288x32xbf16>
    %18 = tpu.concatenate %1, %3, %5, %7, %9, %11, %13, %15, %17 in 1 : vector<288x32xbf16>, vector<288x32xbf16>, vector<288x32xbf16>, vector<288x32xbf16>, vector<288x32xbf16>, vector<288x32xbf16>, vector<288x32xbf16>, vector<288x32xbf16>, vector<288x32xbf16> -> vector<288x288xbf16>
    %c0_18 = arith.constant 0 : index
    %c0_19 = arith.constant 0 : index
    %19 = vector.load %arg2[%c0_18, %c0_19] : memref<288x128xbf16, #tpu.memory_space<vmem>>, vector<288x128xbf16>
    %cst = arith.constant dense<0.000000e+00> : vector<288x128xf32>
    %20 = tpu.matmul %18, %19, %cst {dimension_numbers = #tpu.dot_dimension_numbers<[1], [0], [0], [1], [0, 0, 1, 1], [], []>} : vector<288x288xbf16>, vector<288x128xbf16>, vector<288x128xf32> -> vector<288x128xf32>
    %c0_20 = arith.constant 0 : index
    %c0_21 = arith.constant 0 : index
    %21 = vector.load %arg3[%c0_20, %c0_21] : memref<1x128xf32, #tpu.memory_space<vmem>>, vector<1x128xf32>
    %22 = vector.broadcast %21 : vector<1x128xf32> to vector<288x128xf32>
    %23 = arith.addf %20, %22 : vector<288x128xf32>
    %24 = vector.shape_cast %23 : vector<288x128xf32> to vector<1x288x128xf32>
    %c0_22 = arith.constant 0 : index
    %c0_23 = arith.constant 0 : index
    %c0_24 = arith.constant 0 : index
    %25 = vector.load %arg4[%c0_22, %c0_23, %c0_24] : memref<1x288x128xf32, #tpu.memory_space<vmem>>, vector<1x288x128xf32>
    tpu.vector_store %arg4[%c0_22, %c0_23, %c0_24], %24 {strides = array<i32>} : memref<1x288x128xf32, #tpu.memory_space<vmem>>, vector<1x288x128xf32>,
    return
  }
  func.func @transform_0(%arg0: i32) -> (i32, i32, i32) {
    %c0_i32 = arith.constant 0 : i32
    %c0_i32_0 = arith.constant 0 : i32
    %c0_i32_1 = arith.constant 0 : i32
    return %arg0, %c0_i32, %c0_i32_0 : i32, i32, i32
  }
  func.func @transform_1(%arg0: i32) -> (i32, i32) {
    %c0_i32 = arith.constant 0 : i32
    %c0_i32_0 = arith.constant 0 : i32
    %c0_i32_1 = arith.constant 0 : i32
    return %c0_i32, %c0_i32_0 : i32, i32
  }
  func.func @transform_2(%arg0: i32) -> (i32, i32) {
    %c0_i32 = arith.constant 0 : i32
    %c0_i32_0 = arith.constant 0 : i32
    %c0_i32_1 = arith.constant 0 : i32
    return %c0_i32, %c0_i32_0 : i32, i32
  }
  func.func @transform_3(%arg0: i32) -> (i32, i32, i32) {
    %c0_i32 = arith.constant 0 : i32
    %c0_i32_0 = arith.constant 0 : i32
    %c0_i32_1 = arith.constant 0 : i32
    return %arg0, %c0_i32, %c0_i32_0 : i32, i32, i32
  }
}

</mosaic_0001>

<bundles_post_ra>
// kernel: tpu_custom_call.1
= control target key start
LH: loop header
LB: loop body
LE: loop exit
PB: predicated region body
PF: predicated region fallthrough
CT: control target
= control target key end

     0   :  { %8 = vsyncpa [#allocation3], 0  ;;  %s3599_s0 = inlined_call_operand.vmem [shape: bf16[2,342,32], index: 0, kind: input, shape index: {}]   ;;  %s3600_s1 = inlined_call_operand.vmem [shape: bf16[288,128], index: 1, kind: input, shape index: {}]   ;;  %s3601_s2 = inlined_call_operand.vmem [shape: f32[1,128], index: 2, kind: input, shape index: {}]   ;;  %s3602_s3 = inlined_call_operand.hbm [shape: f32[2,288,128], index: 3, kind: output, shape index: {}]  }
   0x1   :  { %10 = vsyncpa [#allocation3 + $0x1], 0  ;;  %s2331_s12 = smov 0   ;;  %s2333_s13 = smov 0  }
   0x2   :  { %s2335_s14 = smov 0   ;;  %s2337_s15 = smov 0  }
   0x3 LB: > { %s2352_s16 = sadd.s32 4294967295, %s2302_s15   ;;  %s1967_s17 = sadd.s32 4294967294, %s2302_s15   ;;  %s2302_s15 = sphi %s2337_s15, %s3610_s15   ;;  %s2298_s14 = sphi %s2335_s14, %s3609_s14   ;;  %s2294_s13 = sphi %s2333_s13, %s3608_s13   ;;  %s2290_s12 = sphi %s2331_s12, %s3607_s12  }
   0x4   : > { %s2356_s18 = sadd.s32 1, %s2302_s15   ;;  %s91_s19 = sadd.s32 1, %s2298_s14 }
   0x5   : > { %s88_s20 = ssub.s32 %s2302_s15, %s2356_s18  ;;  %p101_p0 = scmp.ne.s32.totalorder %s2298_s14, %s2294_s13 }
   0x6   : > { %p89_p1 = scmp.eq.s32.totalorder %s88_s20, 0  ;;  %p102_p2 = scmp.eq.s32.totalorder %s2352_s16, 1 }
   0x7   : > { %p107_p3 = scmp.ne.s32.totalorder %s2294_s13, %s2290_s12  ;;  %p108_p4 = scmp.eq.s32.totalorder %s1967_s17, 1 }
   0x8   : > { %s2367_s21 = scalar_select %p89_p1, %s2298_s14, %s91_s19  }
   0x9   : > { %p2369_p5 = por %p102_p2, %p101_p0  ;;  %p2373_p6 = por %p108_p4, %p107_p3 }
   0xa   : > { %p1970_p7 = scmp.ge.s32.totalorder %s2302_s15, 1  ;;  %p140_p8 = scmp.lt.s32.totalorder %s2302_s15, 3 }
   0xc   : > { %p141_p9 = pnand %p1970_p7, %p140_p8 }
   0xd   : > { %p164_p10 = scmp.lt.s32.totalorder (!%p141_p9), %s2352_s16, 1  ;;  %v2198_v0 = vld [vmem:[%s3600_s1] sm:$0xff] (!%p141_p9)   ;;  %v2304_v1 = vmov (!%p141_p9), 0   ;;  %v2200_v2 = vld [vmem:[%s3600_s1 + $0x8] sm:$0xff] (!%p141_p9)   ;;  %vm725_vm0 = vcmask (!%p141_p9), 1045504   ;;  %vm501_vm1 = vcmask (!%p141_p9), 1046528  }
   0xe   : > { %144 = sbr.rel (%p141_p9) target bundleno = 596 (0x254), region = 32  ;;  %1501 = vmatprep.subr.bf16.mxu0 (!%p141_p9), %v2304_v1  ;;  %2102 = vmatprep.subr.bf16.mxu1 (!%p141_p9), %v2304_v1  ;;  %v2201_v3 = vld [vmem:[%s3600_s1 + $0x10] sm:$0xff] (!%p141_p9)   ;;  %v2202_v13 = vld [vmem:[%s3600_s1 + $0x18] sm:$0xff] (!%p141_p9)   ;;  %v2203_v32 = vld [vmem:[%s3600_s1 + $0x20] sm:$0xff] (!%p141_p9)   ;;  %s2305_s17 = smov (!%p141_p9), 64   ;;  %vm1023_vm5 = vcmask (!%p141_p9), 261120  }
   0xf   : > { %1502 = vmatpush1.bf16.msra.mxu0 (!%p141_p9), %v2198_v0  ;;  %2118 = vmatpush1.bf16.msra.mxu1 (!%p141_p9), %v2198_v0  ;;  %s2306_s19 = smov (!%p141_p9), 32   ;;  %vm313_vm2 = vsmask.f32 (!%p141_p9), 7424  ;;  %s2307_s20 = smov (!%p141_p9), 96   ;;  %vm855_vm3 = vsmask.f32 (!%p141_p9), 5376 }
  0x10   : > { %1503 = vmatprep.subr.bf16.mxu0 (!%p141_p9), %v2304_v1  ;;  %2103 = vmatprep.subr.bf16.mxu1 (!%p141_p9), %v2304_v1  ;;  %vm631_vm4 = vsmask.f32 (!%p141_p9), 6400  ;;  %vm1060_vm6 = vcmask (!%p141_p9), 523264   ;;  %vm1097_vm7 = vcmask (!%p141_p9), 785408   ;;  %vm985_vm8 = vcmask (!%p141_p9), 1044480   ;;  %s2136_s11 = smul.u32 (!%p141_p9), 4608, %s2352_s16 }
  0x12   : > { %s3549_s27 = scalar_lea.hbm (!%p141_p9), %s3602_s3, %s2136_s11 }
  0x13   : > { %1504 = vmatpush1.bf16.msra.mxu0 (!%p141_p9), %v2200_v2  ;;  %2119 = vmatpush1.bf16.msra.mxu1 (!%p141_p9), %v2200_v2 }
  0x14   : > { %1505 = vmatprep.subr.bf16.mxu0 (!%p141_p9), %v2304_v1  ;;  %2104 = vmatprep.subr.bf16.mxu1 (!%p141_p9), %v2304_v1 }
  0x15   : > { %s165_s26 = scalar_select %p164_p10, %s2352_s16, 1 }
  0x17   : > { %s2135_s29 = smul.u32 172, %s165_s26  ;;  %1506 = vmatpush1.bf16.msra.mxu0 %v2201_v3  ;;  %2120 = vmatpush1.bf16.msra.mxu1 %v2201_v3 }
  0x18   : > { %1507 = vmatprep.subr.bf16.mxu0 %v2304_v1  ;;  %2105 = vmatprep.subr.bf16.mxu1 %v2304_v1 }
  0x19   : > { %s2394_s5 = scalar_lea.vmem %s3599_s0, %s2135_s29  ;;  %s2308_s29 = smov [#allocation2]  }
  0x1a   : > { %v175_v4 = vld [vmem:[%s2394_s5 + $0x14] sm:$0xf]  ;;  %v214_v5 = vld [vmem:[%s2394_s5 + $0x10] sm:$0xc]  ;;  %v2402_v6 = vld [vmem:[%s2394_s5 + $0x18] sm:$0xff]   ;;  %s2244_s30 = sshll.u32 %s2308_s29, 4  ;;  %s2245_s30 = int_to_ptr.vmem [resolvable:$false] %s2244_s30 }
  0x1b   : > { %v174_v7 = vld [vmem:[%s2394_s5 + $0x10] sm:$0xf]  ;;  %v2407_v8 = vcombine.low %v214_v5, %v175_v4  ;;  %v173_v10 = vld [vmem:[%s2394_s5 + $0xc] sm:$0xf]  ;;  %v208_v11 = vld [vmem:[%s2394_s5 + $0x8] sm:$0xe]  ;;  %1508 = vmatpush1.bf16.msra.mxu0 %v2202_v13  ;;  %2121 = vmatpush1.bf16.msra.mxu1 %v2202_v13 }
  0x1c   : > { %v2409_v9 = vcombine.low %v174_v7, %v175_v4  ;;  %v213_v12 = vld [vmem:[%s2394_s5 + $0x8] sm:$0xc]  ;;  %v2418_v14 = vrot.slane %v2402_v6, 2  ;;  %v171_v17 = vld [vmem:[%s2394_s5 + $0x4] sm:$0xf]  ;;  %v2423_v18 = vld [vmem:[%s2394_s5 + $0x78] sm:$0xff]   ;;  %v2429_v22 = vcombine.low %v208_v11, %v173_v10  ;;  %1509 = vmatprep.subr.bf16.mxu0 %v2304_v1  ;;  %2106 = vmatprep.subr.bf16.mxu1 %v2304_v1 }
  0x1d   : > { %v1996_v15 = vcombine.low %v213_v12, %v173_v10  ;;  %v172_v16 = vld [vmem:[%s2394_s5 + $0x8] sm:$0xf]  ;;  %v810_v19 = vrot.slane %v2407_v8, 2  ;;  %v207_v23 = vld [vmem:[%s2394_s5] sm:$0xe]  ;;  %v753_v31 = vrot.slane %v2423_v18, 2 }
  0x1e   : > { %v727_v20 = vrot.slane %v2409_v9, 2  ;;  %v2427_v21 = vcombine.low %v172_v16, %v173_v10  ;;  %v170_v24 = vld [vmem:[%s2394_s5] sm:$0xf]  ;;  %v1991_v26 = vcombine.low %v207_v23, %v171_v17  ;;  %v2451_v36 = vrot.slane %v2409_v9, 1  ;;  %v2470_v47 = vld [vmem:[%s2394_s5 + $0x70] sm:$0xff]   ;;  %v2206_v16 = vld [vmem:[%s3600_s1 + $0x28] sm:$0xff]  }
  0x1f   : > { %v726_v25 = vrot.slane %v1996_v15, 2  ;;  %v2433_v27 = vcombine.low %v170_v24, %v171_v17  ;;  %v2436_v28 = vld [vmem:[%s2394_s5 + $0x80] sm:$0xff]   ;;  %v811_v29 = vsel %vm725_vm0, %v810_v19, %v2418_v14  ;;  %v586_v38 = vrot.slane %v2429_v22, 1  ;;  %1510 = vmatpush1.bf16.msra.mxu0 %v2203_v32  ;;  %2122 = vmatpush1.bf16.msra.mxu1 %v2203_v32  ;;  %v2535_v15 = vld [vmem:[%s2394_s5 + $0x88] sm:$0xff]   ;;  %v2208_v32 = vld [vmem:[%s3600_s1 + $0x30] sm:$0xff]   ;;  %s2246_s4 = scalar_lea.vmem %s2245_s30, 9216 }
  0x20   : > { %v503_v30 = vrot.slane %v2427_v21, 1  ;;  %816 = vrot.lane.b32.xlu1 %v811_v29, %s2305_s17  ;;  %v502_v34 = vrot.slane %v1991_v26, 1  ;;  %v755_v35 = vrot.slane %v2436_v28, 2  ;;  %v2454_v37 = vld [vmem:[%s2394_s5 + $0x20] sm:$0xff]   ;;  %v322_v41 = vshll.u32 %v2427_v21, 16  ;;  %1511 = vmatprep.subr.bf16.mxu0 %v2304_v1 }
  0x21   : > { %v728_v33 = vsel %vm725_vm0, %v726_v25, %v727_v20  ;;  %v315_v39 = vshrl.u32 %v2433_v27, 16  ;;  %v317_v40 = vshll.u32 %v2433_v27, 16  ;;  %v730_v42 = vsel %vm725_vm0, %v727_v20, %v2418_v14  ;;  %2107 = vmatprep.subr.bf16.mxu1 %v2304_v1 }
  0x22   : > { %763 = vrot.lane.b32.xlu0 %v728_v33, %s2306_s19  ;;  %v504_v43 = vsel %vm501_vm1, %v502_v34, %v503_v30  ;;  %v731_v44 = vrot.slane %v2454_v37, 2  ;;  %v326_v46 = vshrl.u32 %v2427_v21, 16  ;;  %v330_v48 = vshll.u32 %v2409_v9, 16 }
  0x23   : > { %v319_v45 = vrot.slane %v317_v40, 1  ;;  %v2476_v49 = vshll.u32 %v2402_v6, 16  ;;  %v2479_v50 = vshrl.u32 %v2402_v6, 16  ;;  %v857_v51 = vshrl.u32 %v2407_v8, 16  ;;  %1512 = vmatpush1.bf16.msra.mxu0 %v2206_v16  ;;  %2123 = vmatpush1.bf16.msra.mxu1 %v2206_v16 }
  0x24   : > { %539 = vrot.lane.b32.xlu1 %v504_v43, %s2305_s17  ;;  %v2488_v52 = vsel %vm725_vm0, %v753_v31, %v755_v35  ;;  %v587_v53 = vsel %vm501_vm1, %v586_v38, %v2451_v36  ;;  %v324_v55 = vrot.slane %v322_v41, 1  ;;  %v860_v57 = vshll.u32 %v2407_v8, 16  ;;  %1513 = vmatprep.subr.bf16.mxu0 %v2304_v1  ;;  %v2210_v38 = vld [vmem:[%s3600_s1 + $0x38] sm:$0xff]  }
  0x25   : > { %v320_v54 = vor.u32 %v319_v45, %v315_v39  ;;  %v859_v56 = vrot.slane %v857_v51, 2  ;;  %v864_v58 = vrot.slane %v2479_v50, 2  ;;  %v865_v59 = vrot.slane %v2476_v49, 3  ;;  %2108 = vmatprep.subr.bf16.mxu1 %v2304_v1 }
  0x26   : > { %765 = vrot.lane.b32.xlu0 %v730_v42, %s2306_s19  ;;  %v2497_v60 = vshll.u32 %v2470_v47, 16  ;;  %v2505_v61 = vsel %vm725_vm0, %v2418_v14, %v731_v44  ;;  %v328_v62 = vor.u32 %v326_v46, %v324_v55  ;;  %v2509_v63 = vrot.slane %v330_v48, 1 }
  0x27   : > { %v862_v0 = vrot.slane %v860_v57, 3  ;;  %v325_v2 = vsel %vm313_vm2, %v320_v54, %v324_v55  ;;  %v866_v3 = vor.u32 %v865_v59, %v864_v58  ;;  %v2515_v4 = vshll.u32 %v2454_v37, 16  ;;  %1514 = vmatpush1.bf16.msra.mxu0 %v2208_v32  ;;  %2124 = vmatpush1.bf16.msra.mxu1 %v2208_v32  ;;  %v2217_v32 = vld [vmem:[%s3600_s1 + $0x58] sm:$0xff]  }
  0x28   : > { %592 = vrot.lane.b32.xlu1 %v587_v53, %s2307_s20  ;;  %v2518_v5 = vshrl.u32 %v2454_v37, 16  ;;  %v3603_v8 = vrot.slane %v2497_v60, 1  ;;  %v2522_v10 = vshrl.u32 %v2470_v47, 16  ;;  %v2525_v11 = vshll.u32 %v2423_v18, 16  ;;  %1515 = vmatprep.subr.bf16.mxu0 %v2304_v1 }
  0x29   : > { %v863_v7 = vor.u32 %v862_v0, %v859_v56  ;;  %v333_v12 = vsel %vm313_vm2, %v328_v62, %v2509_v63  ;;  %v869_v14 = vrot.slane %v2515_v4, 3  ;;  %v506_v23 = vsel %vm501_vm1, %v503_v30, %v2451_v36  ;;  %2109 = vmatprep.subr.bf16.mxu1 %v2304_v1 }
  0x2a   : > { %791 = vrot.lane.b32.xlu0 %v2488_v52, %s2306_s19  ;;  %v868_v13 = vrot.slane %v2518_v5, 2  ;;  %v432_v19 = vor.u32 %v2522_v10, %v3603_v8  ;;  %v436_v20 = vrot.slane %v2525_v11, 1  ;;  %v757_v25 = vrot.slane %v2535_v15, 2 }
  0x2b   : > { %v867_v17 = vsel %vm855_vm3, %v863_v7, %v866_v3  ;;  %v2556_v26 = vshll.u32 %v2436_v28, 16  ;;  %v2559_v29 = vshrl.u32 %v2436_v28, 16  ;;  %v2569_v33 = vshll.u32 %v2535_v15, 16  ;;  %1516 = vmatpush1.bf16.msra.mxu0 %v2210_v38  ;;  %2125 = vmatpush1.bf16.msra.mxu1 %v2210_v38 }
  0x2c   : > { %818 = vrot.lane.b32.xlu1 %v2505_v61, %s2305_s17  ;;  %v2552_v24 = vor.u32 %v869_v14, %v868_v13  ;;  %v437_v30 = vsel %vm313_vm2, %v432_v19, %v436_v20  ;;  %v2572_v34 = vshrl.u32 %v2535_v15, 16  ;;  %v507_v39 = vrot.slane %v2402_v6, 1  ;;  %1517 = vmatprep.subr.bf16.mxu0 %v2304_v1 }
  0x2d   : > { %v2588_v41 = vsel %vm725_vm0, %v755_v35, %v757_v25  ;;  %v529_v42 = vrot.slane %v2470_v47, 1  ;;  %v531_v43 = vrot.slane %v2423_v18, 1  ;;  %v916_v45 = vrot.slane %v2559_v29, 2  ;;  %v2211_v35 = vld [vmem:[%s3600_s1 + $0x40] sm:$0xff]   ;;  %2110 = vmatprep.subr.bf16.mxu1 %v2304_v1 }
  0x2e   : > { %462 = vrot.lane.b32.xlu0 %v325_v2, %s2306_s19  ;;  %v871_v40 = vsel %vm855_vm3, %v866_v3, %v2552_v24  ;;  %v917_v46 = vrot.slane %v2556_v26, 3  ;;  %v920_v51 = vrot.slane %v2572_v34, 2  ;;  %v921_v53 = vrot.slane %v2569_v33, 3  ;;  %v2638_v3 = vld [vmem:[%s2394_s5 + $0x28] sm:$0xff]  }
  0x2f   : > { %v2608_v54 = vsel %vm501_vm1, %v2451_v36, %v507_v39  ;;  %v533_v55 = vrot.slane %v2436_v28, 1  ;;  %v334_v56 = vshrl.u32 %v2409_v9, 16  ;;  %v2616_v57 = vsel %vm501_vm1, %v529_v42, %v531_v43  ;;  %1518 = vmatpush1.bf16.msra.mxu0 %v2211_v35  ;;  %v2214_v36 = vld [vmem:[%s3600_s1 + $0x48] sm:$0xff]   ;;  %2126 = vmatpush1.bf16.msra.mxu1 %v2211_v35 }
  0x30   : > { %464 = vrot.lane.b32.xlu1 %v333_v12, %s2306_s19  ;;  %v2618_v58 = vor.u32 %v917_v46, %v916_v45  ;;  %v2620_v59 = vor.u32 %v921_v53, %v920_v51  ;;  %1519 = vmatprep.subr.bf16.mxu0 %v2304_v1  ;;  %v340_v2 = vrot.slane %v2476_v49, 1  ;;  %v2215_v12 = vld [vmem:[%s3600_s1 + $0x50] sm:$0xff]   ;;  %v733_v13 = vrot.slane %v2638_v3, 2 }
  0x31   : > { %v2633_v62 = vsel %vm501_vm1, %v531_v43, %v533_v55  ;;  %v336_v0 = vor.u32 %v334_v56, %v2509_v63  ;;  %2111 = vmatprep.subr.bf16.mxu1 %v2304_v1  ;;  %v2655_v14 = vshll.u32 %v2638_v3, 16  ;;  %v2658_v16 = vshrl.u32 %v2638_v3, 16 }
  0x32   : > { %946 = vrot.lane.b32.xlu0 %v867_v17, %s2307_s20  ;;  %v923_v7 = vsel %vm855_vm3, %v2618_v58, %v2620_v59  ;;  %v641_v17 = vrot.slane %v330_v48, 2  ;;  %v640_v19 = vrot.slane %v334_v56, 1  ;;  %v2682_v48 = vsel %vm725_vm0, %v731_v44, %v733_v13  ;;  %v2218_v44 = vld [vmem:[%s3600_s1 + $0x60] sm:$0xff]  }
  0x33   : > { %1520 = vmatpush1.bf16.msra.mxu0 %v2214_v36  ;;  %2127 = vmatpush1.bf16.msra.mxu1 %v2214_v36  ;;  %v341_v63 = vsel %vm313_vm2, %v336_v0, %v340_v2  ;;  %v872_v38 = vrot.slane %v2658_v16, 2  ;;  %v444_v45 = vrot.slane %v2556_v26, 1  ;;  %v633_v46 = vshrl.u32 %v2429_v22, 16 }
  0x34   : > { %541 = vrot.lane.b32.xlu1 %v506_v23, %s2305_s17  ;;  %1521 = vmatprep.subr.bf16.mxu0 %v2304_v1  ;;  %v2664_v23 = vshrl.u32 %v2423_v18, 16  ;;  %v636_v51 = vshll.u32 %v2429_v22, 16  ;;  %v644_v36 = vrot.slane %v2479_v50, 1  ;;  %v700_v28 = vrot.slane %v2572_v34, 1 }
  0x35   : > { %2112 = vmatprep.subr.bf16.mxu1 %v2304_v1  ;;  %v635_v22 = vrot.slane %v633_v46, 1 }
  0x36   : > { %490 = vrot.lane.b32.xlu0 %v437_v30, %s2306_s19  ;;  %v2672_v30 = vld [vmem:[%s2394_s5 + $0x90] sm:$0xff]   ;;  %v440_v43 = vor.u32 %v2664_v23, %v436_v20  ;;  %v638_v56 = vrot.slane %v636_v51, 2  ;;  %v697_v51 = vrot.slane %v2556_v26, 2 }
  0x37   : > { %1522 = vmatpush1.bf16.msra.mxu0 %v2215_v12  ;;  %2128 = vmatpush1.bf16.msra.mxu1 %v2215_v12  ;;  %v2699_v53 = vrot.slane %v2672_v30, 2  ;;  %v705_v20 = vshrl.u32 %v2672_v30, 16  ;;  %v645_v12 = vrot.slane %v2476_v49, 2  ;;  %v701_v49 = vrot.slane %v2569_v33, 2 }
  0x38   : > { %948 = vrot.lane.b32.xlu1 %v871_v40, %s2307_s20  ;;  %1523 = vmatprep.subr.bf16.mxu0 %v2304_v1  ;;  %v873_v40 = vrot.slane %v2655_v14, 3  ;;  %v445_v0 = vsel %vm313_vm2, %v440_v43, %v444_v45 }
  0x39   : > { %2113 = vmatprep.subr.bf16.mxu1 %v2304_v1 }
  0x3a   : > { %844 = vrot.lane.b32.xlu0 %v2588_v41, %s2305_s17  ;;  %v2705_v35 = vor.u32 %v873_v40, %v872_v38  ;;  %v693_v38 = vrot.slane %v2525_v11, 2  ;;  %v696_v40 = vrot.slane %v2559_v29, 1 }
  0x3b   : > { %1524 = vmatpush1.bf16.msra.mxu0 %v2217_v32  ;;  %2129 = vmatpush1.bf16.msra.mxu1 %v2217_v32  ;;  %v692_v32 = vrot.slane %v2664_v23, 1 }
  0x3c   : > { %594 = vrot.lane.b32.xlu1 %v2608_v54, %s2307_s20  ;;  %1525 = vmatprep.subr.bf16.mxu0 %v2304_v1  ;;  %v875_v43 = vsel %vm855_vm3, %v2552_v24, %v2705_v35 }
  0x3d   : > { %2114 = vmatprep.subr.bf16.mxu1 %v2304_v1 }
  0x3e   : > { %567 = vrot.lane.b32.xlu0 %v2616_v57, %s2305_s17 }
  0x3f   : > { %1526 = vmatpush1.bf16.msra.mxu0 %v2218_v44  ;;  %2130 = vmatpush1.bf16.msra.mxu1 %v2218_v44  ;;  %v924_v44 = vrot.slane %v705_v20, 2 }
  0x40   : > { %620 = vrot.lane.b32.xlu1 %v2633_v62, %s2307_s20  ;;  %1527 = vmatprep.subr.bf16.mxu0 %v2304_v1 }
  0x41   : > { %2115 = vmatprep.subr.bf16.mxu1 %v2304_v1 }
  0x42   : > { %974 = vrot.lane.b32.xlu0 %v923_v7, %s2307_s20  ;;  %v708_v7 = vshll.u32 %v2672_v30, 16 }
  0x44   : > { %466 = vrot.lane.b32.xlu1 %v341_v63, %s2306_s19  ;;  %v509_v63 = vrot.slane %v2454_v37, 1 }
  0x46   : > { %767 = vrot.lane.b32.xlu0 %v2505_v61, %s2306_s19  ;;  %v642_v61 = vor.u32 %v641_v17, %v640_v19  ;;  %v2219_v17 = vld [vmem:[%s3600_s1 + $0x68] sm:$0xff]   ;;  %v646_v19 = vor.u32 %v645_v12, %v644_v36  ;;  %v2221_v36 = vld [vmem:[%s3600_s1 + $0x70] sm:$0xff]  }
  0x47   : > { %1528 = vmatpush1.bf16.msra.mxu0 %v2219_v17  ;;  %2131 = vmatpush1.bf16.msra.mxu1 %v2219_v17  ;;  %v2770_v17 = vld [vmem:[%s2394_s5 + $0x30] sm:$0xff]  }
  0x48   : > { %820 = vrot.lane.b32.xlu1 %v2682_v48, %s2305_s17  ;;  %v2742_v24 = vsel %vm631_vm4, %v642_v61, %v646_v19  ;;  %1529 = vmatprep.subr.bf16.mxu0 %v2304_v1 }
  0x49   : > { %2116 = vmatprep.subr.bf16.mxu1 %v2304_v1 }
  0x4a   : > { %793 = vrot.lane.b32.xlu0 %v2588_v41, %s2306_s19  ;;  %v639_v41 = vor.u32 %v638_v56, %v635_v22  ;;  %v925_v22 = vrot.slane %v708_v7, 3  ;;  %v2744_v56 = vor.u32 %v693_v38, %v692_v32  ;;  %v648_v32 = vrot.slane %v2518_v5, 1 }
  0x4b   : > { %1530 = vmatpush1.bf16.msra.mxu0 %v2221_v36  ;;  %2132 = vmatpush1.bf16.msra.mxu1 %v2221_v36  ;;  %v649_v38 = vrot.slane %v2515_v4, 2  ;;  %v2826_v36 = vld [vmem:[%s2394_s5 + $0x98] sm:$0xff]  }
  0x4c   : > { %543 = vrot.lane.b32.xlu1 %v2608_v54, %s2305_s17  ;;  %v760_v54 = vsel %vm725_vm0, %v757_v25, %v2699_v53  ;;  %v2733_v46 = vsel %vm631_vm4, %v639_v41, %v642_v61  ;;  %v2746_v25 = vor.u32 %v697_v51, %v696_v40  ;;  %v510_v61 = vsel %vm501_vm1, %v507_v39, %v509_v63  ;;  %v2222_v41 = vld [vmem:[%s3600_s1 + $0x78] sm:$0xff]  }
  0x4d   : > { %v2763_v12 = vor.u32 %v925_v22, %v924_v44  ;;  %1531 = vmatprep.subr.bf16.mxu0 %v2304_v1  ;;  %v348_v39 = vrot.slane %v2515_v4, 1  ;;  %2117 = vmatprep.subr.bf16.mxu1 %v2304_v1  ;;  %v735_v1 = vrot.slane %v2770_v17, 2  ;;  %v702_v40 = vor.u32 %v701_v49, %v700_v28 }
  0x4e   : > { %492 = vrot.lane.b32.xlu0 %v445_v0, %s2306_s19  ;;  %v2760_v0 = vrot.slane %v2535_v15, 1  ;;  %v344_v15 = vor.u32 %v2479_v50, %v340_v2  ;;  %v650_v50 = vor.u32 %v649_v38, %v648_v32  ;;  %v2804_v2 = vshrl.u32 %v2770_v17, 16 }
  0x4f   : > { %1532 = vmatpush1.bf16.msra.mxu0 %v2222_v41  ;;  %2133 = vmatpush1.bf16.msra.mxu1 %v2222_v41  ;;  %v2811_v51 = vsel %vm631_vm4, %v2746_v25, %v702_v40  ;;  %v2821_v44 = vsel %vm725_vm0, %v733_v13, %v735_v1  ;;  %v448_v41 = vor.u32 %v2559_v29, %v444_v45  ;;  %v653_v32 = vrot.slane %v2655_v14, 2 }
  0x50   : > { %950 = vrot.lane.b32.xlu1 %v875_v43, %s2307_s20  ;;  %v2779_v6 = vsel %vm501_vm1, %v533_v55, %v2760_v0  ;;  %v349_v55 = vsel %vm313_vm2, %v344_v15, %v348_v39  ;;  %v2807_v43 = vsel %vm631_vm4, %v646_v19, %v650_v50  ;;  %v876_v22 = vrot.slane %v2804_v2, 2 }
  0x51   : > { %v452_v15 = vrot.slane %v2569_v33, 1  ;;  %v812_v26 = vrot.slane %v2826_v36, 2  ;;  %v929_v29 = vshrl.u32 %v2826_v36, 16  ;;  %v710_v45 = vrot.slane %v708_v7, 2 }
  0x52   : > { %846 = vrot.lane.b32.xlu0 %v760_v54, %s2305_s17  ;;  %v932_v49 = vshll.u32 %v2826_v36, 16  ;;  %v2971_v36 = vld [vmem:[%s2394_s5 + $0x40] sm:$0xff]  }
  0x53   : > { %v453_v28 = vsel %vm313_vm2, %v448_v41, %v452_v15  ;;  %v2205_v41 = vld [vmem:[%s2394_s5 + $0x98] ss:$0 sps:$4 sm:$0x33]  }
  0x54   : > { %596 = vrot.lane.b32.xlu1 %v510_v61, %s2307_s20  ;;  %v717_v8 = vshll.u32 %v2205_v41, 16 }
  0x56   : > { %569 = vrot.lane.b32.xlu0 %v2633_v62, %s2305_s17  ;;  %v927_v62 = vsel %vm855_vm3, %v2620_v59, %v2763_v12  ;;  %v2801_v59 = vshll.u32 %v2770_v17, 16 }
  0x58   : > { %622 = vrot.lane.b32.xlu1 %v2779_v6, %s2307_s20  ;;  %v877_v19 = vrot.slane %v2801_v59, 3 }
  0x5a   : > { %976 = vrot.lane.b32.xlu0 %v927_v62, %s2307_s20  ;;  %v707_v62 = vrot.slane %v705_v20, 1  ;;  %v2839_v38 = vor.u32 %v877_v19, %v876_v22  ;;  %v813_v22 = vsel %vm725_vm0, %v2699_v53, %v812_v26  ;;  %v931_v19 = vrot.slane %v929_v29, 2 }
  0x5b   : > { %v588_v29 = vrot.slane %v2672_v30, 1 }
  0x5c   : > { %468 = vrot.lane.b32.xlu1 %v349_v55, %s2306_s19  ;;  %v711_v55 = vor.u32 %v710_v45, %v707_v62  ;;  %v879_v7 = vsel %vm855_vm3, %v2705_v35, %v2839_v38  ;;  %v912_v62 = vrot.slane %v2664_v23, 2  ;;  %v913_v45 = vrot.slane %v2525_v11, 3 }
  0x5d   : > { %v714_v35 = vshrl.u32 %v2205_v41, 16  ;;  %v589_v37 = vsel %vm501_vm1, %v2760_v0, %v588_v29 }
  0x5e   : > { %769 = vrot.lane.b32.xlu0 %v2682_v48, %s2306_s19  ;;  %v652_v48 = vrot.slane %v2658_v16, 1  ;;  %v2878_v23 = vor.u32 %v913_v45, %v912_v62 }
  0x5f   : > { %v716_v11 = vrot.slane %v714_v35, 1  ;;  %v2209_v35 = vld [vmem:[%s2394_s5 + $0xa0] ss:$0 sps:$4 sm:$0x33]  }
  0x60   : > { %822 = vrot.lane.b32.xlu1 %v2821_v44, %s2305_s17  ;;  %v654_v13 = vor.u32 %v653_v32, %v652_v48  ;;  %v934_v48 = vrot.slane %v932_v49, 3  ;;  %v657_v32 = vrot.slane %v2801_v59, 2 }
  0x62   : > { %795 = vrot.lane.b32.xlu0 %v760_v54, %s2306_s19  ;;  %v2850_v20 = vsel %vm631_vm4, %v650_v50, %v654_v13  ;;  %v511_v54 = vrot.slane %v2638_v3, 1  ;;  %v2864_v50 = vsel %vm631_vm4, %v702_v40, %v711_v55  ;;  %v2880_v49 = vor.u32 %v934_v48, %v931_v19  ;;  %v2207_v48 = vld [vmem:[%s2394_s5 + $0x90] ss:$0 sps:$4 sm:$0x11]  }
  0x63   : > { %v356_v19 = vrot.slane %v2655_v14, 1  ;;  %v364_v3 = vrot.slane %v2801_v59, 1 }
  0x64   : > { %545 = vrot.lane.b32.xlu1 %v510_v61, %s2305_s17  ;;  %v656_v61 = vrot.slane %v2804_v2, 1  ;;  %v512_v40 = vsel %vm501_vm1, %v509_v63, %v511_v54  ;;  %v352_v63 = vor.u32 %v2518_v5, %v348_v39 }
  0x66   : > { %494 = vrot.lane.b32.xlu0 %v453_v28, %s2306_s19  ;;  %v658_v28 = vor.u32 %v657_v32, %v656_v61  ;;  %v719_v61 = vrot.slane %v717_v8, 2  ;;  %v936_v8 = vsel %vm855_vm3, %v2763_v12, %v2880_v49  ;;  %v357_v4 = vsel %vm313_vm2, %v352_v63, %v356_v19 }
  0x67   : > { %v761_v12 = vrot.slane %v2205_v41, 2  ;;  %v458_v32 = vshll.u32 %v2207_v48, 16 }
  0x68   : > { %952 = vrot.lane.b32.xlu1 %v879_v7, %s2307_s20  ;;  %v2883_v7 = vsel %vm631_vm4, %v654_v13, %v658_v28  ;;  %v2897_v13 = vld [vmem:[%s2394_s5 + $0x38] sm:$0xff]  }
  0x69   : > { %v737_v5 = vrot.slane %v2897_v13, 2  ;;  %v2911_v14 = vshll.u32 %v2897_v13, 16  ;;  %v2914_v39 = vshrl.u32 %v2897_v13, 16 }
  0x6a   : > { %848 = vrot.lane.b32.xlu0 %v813_v22, %s2305_s17  ;;  %v720_v22 = vor.u32 %v719_v61, %v716_v11  ;;  %v762_v11 = vsel %vm725_vm0, %v2699_v53, %v761_v12  ;;  %v2938_v61 = vld [vmem:[%s2394_s5 + $0xa0] ss:$0 sps:$4 sm:$0x77]   ;;  %v513_v12 = vrot.slane %v2770_v17, 1 }
  0x6b   : > { %v738_v62 = vsel %vm725_vm0, %v735_v1, %v737_v5  ;;  %v880_v45 = vrot.slane %v2914_v39, 2  ;;  %v881_v41 = vrot.slane %v2911_v14, 3  ;;  %v938_v63 = vshrl.u32 %v2938_v61, 16 }
  0x6c   : > { %598 = vrot.lane.b32.xlu1 %v512_v40, %s2307_s20  ;;  %v660_v53 = vrot.slane %v2914_v39, 1  ;;  %v661_v33 = vrot.slane %v2911_v14, 2 }
  0x6d   : > { %v882_v1 = vor.u32 %v881_v41, %v880_v45  ;;  %v940_v41 = vrot.slane %v938_v63, 2 }
  0x6e   : > { %571 = vrot.lane.b32.xlu0 %v2779_v6, %s2305_s17  ;;  %v2904_v6 = vsel %vm631_vm4, %v711_v55, %v720_v22  ;;  %v2920_v55 = vsel %vm855_vm3, %v2878_v23, %v2618_v58  ;;  %v456_v58 = vor.u32 %v2572_v34, %v452_v15  ;;  %v2212_v34 = vld [vmem:[%s2394_s5 + $0x98] ss:$0 sps:$4 sm:$0x11]   ;;  %v2952_v15 = vld [vmem:[%s3600_s1 + $0x80] sm:$0xff]  }
  0x6f   : > { %2062 = vmatprep.subr.bf16.mxu1 %v2952_v15 }
  0x70   : > { %624 = vrot.lane.b32.xlu1 %v589_v37, %s2307_s20  ;;  %v814_v37 = vrot.slane %v2209_v35, 2 }
  0x72   : > { %978 = vrot.lane.b32.xlu0 %v936_v8, %s2307_s20  ;;  %v941_v8 = vshll.u32 %v2938_v61, 16  ;;  %v815_v45 = vsel %vm725_vm0, %v812_v26, %v814_v37 }
  0x74   : > { %470 = vrot.lane.b32.xlu1 %v357_v4, %s2306_s19  ;;  %v883_v4 = vsel %vm855_vm3, %v2839_v38, %v882_v1  ;;  %v943_v35 = vrot.slane %v941_v8, 3  ;;  %v514_v38 = vsel %vm501_vm1, %v511_v54, %v513_v12  ;;  %v2983_v54 = vshll.u32 %v2971_v36, 16 }
  0x75   : > { %v515_v8 = vrot.slane %v2897_v13, 1 }
  0x76   : > { %771 = vrot.lane.b32.xlu0 %v2821_v44, %s2306_s19  ;;  %v460_v44 = vrot.slane %v458_v32, 1  ;;  %v662_v32 = vor.u32 %v661_v33, %v660_v53  ;;  %v885_v63 = vrot.slane %v2983_v54, 3 }
  0x78   : > { %824 = vrot.lane.b32.xlu1 %v738_v62, %s2305_s17  ;;  %v461_v22 = vsel %vm313_vm2, %v456_v58, %v460_v44  ;;  %v590_v58 = vrot.slane %v2212_v34, 1  ;;  %v360_v44 = vor.u32 %v2658_v16, %v356_v19  ;;  %v739_v19 = vrot.slane %v2971_v36, 2  ;;  %v3011_v34 = vld [vmem:[%s2394_s5 + $0x48] sm:$0xff]  }
  0x7a   : > { %797 = vrot.lane.b32.xlu0 %v762_v11, %s2306_s19  ;;  %v2963_v11 = vsel %vm631_vm4, %v658_v28, %v662_v32  ;;  %v591_v28 = vsel %vm501_vm1, %v588_v29, %v590_v58  ;;  %v665_v29 = vrot.slane %v2983_v54, 2  ;;  %v365_v16 = vsel %vm313_vm2, %v360_v44, %v364_v3 }
  0x7b   : > { %v740_v53 = vsel %vm725_vm0, %v737_v5, %v739_v19  ;;  %v3023_v5 = vshrl.u32 %v3011_v34, 16 }
  0x7c   : > { %547 = vrot.lane.b32.xlu1 %v512_v40, %s2305_s17  ;;  %v537_v40 = vrot.slane %v2207_v48, 1  ;;  %v944_v48 = vor.u32 %v943_v35, %v940_v41  ;;  %v3020_v41 = vshll.u32 %v3011_v34, 16 }
  0x7d   : > { %v888_v58 = vrot.slane %v3023_v5, 2 }
  0x7e   : > { %496 = vrot.lane.b32.xlu0 %v461_v22, %s2306_s19  ;;  %v538_v26 = vsel %vm501_vm1, %v2760_v0, %v537_v40  ;;  %v2986_v22 = vshrl.u32 %v2971_v36, 16  ;;  %v945_v0 = vsel %vm855_vm3, %v2880_v49, %v944_v48 }
  0x80   : > { %954 = vrot.lane.b32.xlu1 %v883_v4, %s2307_s20  ;;  %v664_v30 = vrot.slane %v2986_v22, 1  ;;  %v884_v37 = vrot.slane %v2986_v22, 2  ;;  %v516_v4 = vsel %vm501_vm1, %v513_v12, %v515_v8 }
  0x82   : > { %850 = vrot.lane.b32.xlu0 %v815_v45, %s2305_s17  ;;  %v2995_v59 = vor.u32 %v665_v29, %v664_v30  ;;  %v886_v33 = vor.u32 %v885_v63, %v884_v37  ;;  %v372_v45 = vrot.slane %v2911_v14, 1  ;;  %v741_v14 = vrot.slane %v3011_v34, 2 }
  0x84   : > { %600 = vrot.lane.b32.xlu1 %v514_v38, %s2307_s20  ;;  %v3002_v49 = vsel %vm631_vm4, %v662_v32, %v2995_v59  ;;  %v368_v32 = vor.u32 %v2804_v2, %v364_v3  ;;  %v887_v40 = vsel %vm855_vm3, %v882_v1, %v886_v33  ;;  %v889_v1 = vrot.slane %v3020_v41, 3  ;;  %v3036_v3 = vld [vmem:[%s2394_s5 + $0x50] sm:$0xff]  }
  0x85   : > { %v376_v29 = vor.u32 %v2914_v39, %v372_v45 }
  0x86   : > { %573 = vrot.lane.b32.xlu0 %v538_v26, %s2305_s17  ;;  %v373_v12 = vsel %vm313_vm2, %v368_v32, %v372_v45  ;;  %v517_v26 = vrot.slane %v2971_v36, 1  ;;  %v890_v44 = vor.u32 %v889_v1, %v888_v58  ;;  %v743_v45 = vrot.slane %v3036_v3, 2 }
  0x88   : > { %626 = vrot.lane.b32.xlu1 %v591_v28, %s2307_s20  ;;  %v742_v28 = vsel %vm725_vm0, %v739_v19, %v741_v14  ;;  %v518_v30 = vsel %vm501_vm1, %v515_v8, %v517_v26  ;;  %v891_v63 = vsel %vm855_vm3, %v886_v33, %v890_v44  ;;  %v3047_v19 = vshll.u32 %v3036_v3, 16 }
  0x8a   : > { %980 = vrot.lane.b32.xlu0 %v945_v0, %s2307_s20 }
  0x8c   : > { %472 = vrot.lane.b32.xlu1 %v365_v16, %s2306_s19  ;;  %v380_v16 = vrot.slane %v2983_v54, 1 }
  0x8e   : > { %773 = vrot.lane.b32.xlu0 %v738_v62, %s2306_s19  ;;  %v381_v39 = vsel %vm313_vm2, %v376_v29, %v380_v16  ;;  %v744_v29 = vsel %vm725_vm0, %v741_v14, %v743_v45 }
  0x90   : > { %549 = vrot.lane.b32.xlu1 %v514_v38, %s2305_s17 }
  0x92   : > { %826 = vrot.lane.b32.xlu0 %v740_v53, %s2305_s17  ;;  %v817_v62 = vpop.permute.xlu1 %816 }
  0x94   : > { %v764_v35 = vpop.permute.xlu0 %763  ;;  %602 = vrot.lane.b32.xlu1 %v516_v4, %s2307_s20 }
  0x96   : > { %956 = vrot.lane.b32.xlu0 %v887_v40, %s2307_s20  ;;  %v540_v2 = vpop.permute.xlu1 %539 }
  0x98   : > { %v766_v38 = vpop.permute.xlu0 %765  ;;  %474 = vrot.lane.b32.xlu1 %v373_v12, %s2306_s19 }
  0x9a   : > { %775 = vrot.lane.b32.xlu0 %v740_v53, %s2306_s19  ;;  %v593_v48 = vpop.permute.xlu1 %592  ;;  %v3050_v53 = vshrl.u32 %v3036_v3, 16 }
  0x9c   : > { %v3038_v0 = vpop.permute.xlu0 %791  ;;  %551 = vrot.lane.b32.xlu1 %v516_v4, %s2305_s17  ;;  %v1154_v4 = vsel %vm1023_vm5, %v2733_v46, %v764_v35  ;;  %v892_v40 = vrot.slane %v3050_v53, 2  ;;  %v893_v46 = vrot.slane %v3047_v19, 3 }
  0x9e   : > { %828 = vrot.lane.b32.xlu0 %v742_v28, %s2305_s17  ;;  %v819_v37 = vpop.permute.xlu1 %818 }
  0xa0   : > { %v463_v32 = vpop.permute.xlu0 %462  ;;  %604 = vrot.lane.b32.xlu1 %v518_v30, %s2307_s20 }
  0xa1   : > { %v1025_v8 = vsel %vm1023_vm5, %v2433_v27, %v463_v32  ;;  %v1207_v27 = vsel %vm1060_vm6, %v1154_v4, %v817_v62  ;;  %v3071_v32 = vld [vmem:[%s2394_s5 + $0x58] sm:$0xff]   ;;  %v1157_v62 = vsel %vm1023_vm5, %v2742_v24, %v766_v38  ;;  %v388_v4 = vrot.slane %v3020_v41, 1 }
  0xa2   : > { %958 = vrot.lane.b32.xlu0 %v891_v63, %s2307_s20  ;;  %v465_v54 = vpop.permute.xlu1 %464  ;;  %v1062_v33 = vsel %vm1060_vm6, %v1025_v8, %v540_v2  ;;  %v519_v2 = vrot.slane %v3011_v34, 1  ;;  %v894_v63 = vor.u32 %v893_v46, %v892_v40  ;;  %v3083_v40 = vshll.u32 %v3071_v32, 16 }
  0xa3   : > { %v1099_v58 = vsel %vm1097_vm7, %v1062_v33, %v593_v48  ;;  %v384_v48 = vor.u32 %v2986_v22, %v380_v16  ;;  %v1027_v22 = vsel %vm1023_vm5, %v2427_v21, %v465_v54 }
  0xa4   : > { %v947_v35 = vpop.permute.xlu0 %946  ;;  %476 = vrot.lane.b32.xlu1 %v381_v39, %s2306_s19  ;;  %v1209_v39 = vsel %vm1060_vm6, %v1157_v62, %v819_v37  ;;  %v895_v33 = vsel %vm855_vm3, %v890_v44, %v894_v63  ;;  %v745_v37 = vrot.slane %v3071_v32, 2 }
  0xa5   : > { %v1243_v12 = vsel %vm1097_vm7, %v1207_v27, %v947_v35  ;;  %v897_v35 = vrot.slane %v3083_v40, 3  ;;  %v699_v27 = vsel %vm631_vm4, %v2744_v56, %v2746_v25 }
  0xa6   : > { %777 = vrot.lane.b32.xlu0 %v742_v28, %s2306_s19  ;;  %1533 = vmatprep.mubr.bf16.mxu0 %v1243_v12  ;;  %v542_v1 = vpop.permute.xlu1 %541  ;;  %v520_v28 = vsel %vm501_vm1, %v517_v26, %v519_v2  ;;  %v389_v26 = vsel %vm313_vm2, %v384_v48, %v388_v4  ;;  %v746_v25 = vsel %vm725_vm0, %v743_v45, %v745_v37 }
  0xa7   : > { %1534 = vmatmul.mubr.bf16.vlgmr.msra.gmra.mrb[0].mxu0 %v1099_v58  ;;  %v1064_v44 = vsel %vm1060_vm6, %v1027_v22, %v542_v1  ;;  %v521_v58 = vrot.slane %v3036_v3, 1  ;;  %v1196_v1 = vsel %vm1023_vm5, %v699_v27, %v3038_v0  ;;  %v2228_v0 = vld [vmem:[%s3600_s1 + $0x88] sm:$0xff]   ;;  %v392_v22 = vor.u32 %v3023_v5, %v388_v4 }
  0xa8   : > { %v491_v8 = vpop.permute.xlu0 %490  ;;  %553 = vrot.lane.b32.xlu1 %v518_v30, %s2305_s17  ;;  %v3086_v30 = vshrl.u32 %v3071_v32, 16 }
  0xa9   : > { %v1053_v54 = vsel %vm1023_vm5, %v2470_v47, %v491_v8  ;;  %v522_v45 = vsel %vm501_vm1, %v519_v2, %v521_v58 }
  0xaa   : > { %830 = vrot.lane.b32.xlu0 %v744_v29, %s2305_s17  ;;  %v949_v14 = vpop.permute.xlu1 %948  ;;  %v896_v46 = vrot.slane %v3086_v30, 2 }
  0xab   : > { %v1246_v38 = vsel %vm1097_vm7, %v1209_v39, %v949_v14  ;;  %v3112_v14 = vld [vmem:[%s2394_s5 + $0x60] sm:$0xff]  }
  0xac   : > { %v845_v24 = vpop.permute.xlu0 %844  ;;  %606 = vrot.lane.b32.xlu1 %v520_v28, %s2307_s20  ;;  %1541 = vmatprep.mubr.bf16.mxu0 %v1246_v38  ;;  %v898_v39 = vor.u32 %v897_v35, %v896_v46 }
  0xae   : > { %960 = vrot.lane.b32.xlu0 %v895_v33, %s2307_s20  ;;  %v595_v16 = vpop.permute.xlu1 %594  ;;  %v1235_v33 = vsel %vm1060_vm6, %v1196_v1, %v845_v24  ;;  %v396_v24 = vrot.slane %v3047_v19, 1 }
  0xaf   : > { %v1102_v21 = vsel %vm1097_vm7, %v1064_v44, %v595_v16  ;;  %v899_v44 = vsel %vm855_vm3, %v894_v63, %v898_v39  ;;  %v3130_v16 = vshrl.u32 %v3112_v14, 16  ;;  %v747_v63 = vrot.slane %v3112_v14, 2 }
  0xb0   : > { %v568_v12 = vpop.permute.xlu0 %567  ;;  %478 = vrot.lane.b32.xlu1 %v389_v26, %s2306_s19  ;;  %1542 = vmatmul.mubr.bf16.gmra.mrb[4].mxu0 %v1102_v21  ;;  %v397_v2 = vsel %vm313_vm2, %v392_v22, %v396_v24 }
  0xb1   : > { %v1090_v62 = vsel %vm1060_vm6, %v1053_v54, %v568_v12  ;;  %v900_v35 = vrot.slane %v3130_v16, 2  ;;  %v748_v54 = vsel %vm725_vm0, %v745_v37, %v747_v63 }
  0xb2   : > { %779 = vrot.lane.b32.xlu0 %v744_v29, %s2306_s19  ;;  %v621_v48 = vpop.permute.xlu1 %620 }
  0xb3   : > { %v1141_v8 = vsel %vm1097_vm7, %v1090_v62, %v621_v48  ;;  %v3144_v62 = vld [vmem:[%s2394_s5 + $0x68] sm:$0xff]  }
  0xb4   : > { %v975_v38 = vpop.permute.xlu0 %974  ;;  %555 = vrot.lane.b32.xlu1 %v520_v28, %s2305_s17  ;;  %v3127_v28 = vshll.u32 %v3112_v14, 16  ;;  %v3156_v22 = vshll.u32 %v3144_v62, 16 }
  0xb5   : > { %v1285_v29 = vsel %vm1097_vm7, %v1235_v33, %v975_v38 }
  0xb6   : > { %832 = vrot.lane.b32.xlu0 %v746_v25, %s2305_s17  ;;  %1645 = vmatprep.mubr.bf16.mxu1 %v1285_v29  ;;  %v467_v26 = vpop.permute.xlu1 %466  ;;  %v901_v27 = vrot.slane %v3127_v28, 3 }
  0xb7   : > { %1646 = vmatmul.mubr.bf16.vlgmr.msra.gmra.mrb[0].mxu1 %v1141_v8  ;;  %v404_v8 = vrot.slane %v3083_v40, 1 }
  0xb8   : > { %v768_v46 = vpop.permute.xlu0 %767  ;;  %2063 = vmatpush3.bf16.msra.mxu1 %v2952_v15  ;;  %608 = vrot.lane.b32.xlu1 %v522_v45, %s2307_s20  ;;  %v523_v15 = vrot.slane %v3071_v32, 1  ;;  %v902_v1 = vor.u32 %v901_v27, %v900_v35  ;;  %v905_v35 = vrot.slane %v3156_v22, 3 }
  0xb9   : > { %2064 = vmatprep.subr.bf16.mxu1 %v2228_v0  ;;  %v1160_v33 = vsel %vm1023_vm5, %v2807_v43, %v768_v46 }
  0xba   : > { %962 = vrot.lane.b32.xlu0 %v899_v44, %s2307_s20  ;;  %v821_v4 = vpop.permute.xlu1 %820  ;;  %v524_v38 = vsel %vm501_vm1, %v521_v58, %v523_v15  ;;  %v1029_v58 = vsel %vm1023_vm5, %v2409_v9, %v467_v26  ;;  %v3174_v9 = vld [vmem:[%s2394_s5 + $0x78] sm:$0xff]  }
  0xbb   : > { %v1211_v29 = vsel %vm1060_vm6, %v1160_v33, %v821_v4 }
  0xbc   : > { %v794_v12 = vpop.permute.xlu0 %793  ;;  %2065 = vmatpush3.bf16.msra.mxu1 %v2228_v0  ;;  %480 = vrot.lane.b32.xlu1 %v397_v2, %s2306_s19  ;;  %v903_v0 = vsel %vm855_vm3, %v898_v39, %v902_v1  ;;  %v749_v2 = vrot.slane %v3144_v62, 2 }
  0xbe   : > { %781 = vrot.lane.b32.xlu0 %v746_v25, %s2306_s19  ;;  %v544_v21 = vpop.permute.xlu1 %543  ;;  %v400_v25 = vor.u32 %v3050_v53, %v396_v24 }
  0xbf   : > { %v1066_v24 = vsel %vm1060_vm6, %v1029_v58, %v544_v21  ;;  %v525_v21 = vrot.slane %v3112_v14, 1 }
  0xc0   : > { %v493_v48 = vpop.permute.xlu0 %492  ;;  %557 = vrot.lane.b32.xlu1 %v522_v45, %s2305_s17  ;;  %v3159_v45 = vshrl.u32 %v3144_v62, 16  ;;  %v405_v39 = vsel %vm313_vm2, %v400_v25, %v404_v8  ;;  %v1199_v25 = vsel %vm1023_vm5, %v2811_v51, %v794_v12  ;;  %v408_v12 = vor.u32 %v3086_v30, %v404_v8 }
  0xc1   : > { %v1055_v26 = vsel %vm1023_vm5, %v3174_v9, %v493_v48  ;;  %v526_v51 = vsel %vm501_vm1, %v523_v15, %v525_v21  ;;  %v908_v8 = vrot.slane %v2522_v10, 2 }
  0xc2   : > { %834 = vrot.lane.b32.xlu0 %v748_v54, %s2305_s17  ;;  %v951_v37 = vpop.permute.xlu1 %950  ;;  %v904_v4 = vrot.slane %v3159_v45, 2 }
  0xc3   : > { %v1249_v44 = vsel %vm1097_vm7, %v1211_v29, %v951_v37 }
  0xc4   : > { %v847_v43 = vpop.permute.xlu0 %846  ;;  %610 = vrot.lane.b32.xlu1 %v524_v38, %s2307_s20  ;;  %1549 = vmatprep.mubr.bf16.mxu0 %v1249_v44  ;;  %v906_v44 = vor.u32 %v905_v35, %v904_v4  ;;  %v3197_v35 = vld [vmem:[%s2394_s5 + $0x70] sm:$0xff]  }
  0xc5   : > { %v1237_v58 = vsel %vm1060_vm6, %v1199_v25, %v847_v43  ;;  %v751_v15 = vrot.slane %v3197_v35, 2 }
  0xc6   : > { %964 = vrot.lane.b32.xlu0 %v903_v0, %s2307_s20  ;;  %v597_v46 = vpop.permute.xlu1 %596  ;;  %v750_v0 = vsel %vm725_vm0, %v747_v63, %v749_v2  ;;  %v412_v63 = vrot.slane %v3127_v28, 1  ;;  %v907_v43 = vsel %vm855_vm3, %v902_v1, %v906_v44  ;;  %v527_v1 = vrot.slane %v3144_v62, 1 }
  0xc7   : > { %v1105_v33 = vsel %vm1097_vm7, %v1066_v24, %v597_v46  ;;  %v752_v25 = vsel %vm725_vm0, %v749_v2, %v751_v15 }
  0xc8   : > { %v570_v27 = vpop.permute.xlu0 %569  ;;  %482 = vrot.lane.b32.xlu1 %v405_v39, %s2306_s19  ;;  %1550 = vmatmul.mubr.bf16.gmra.mrb[8].mxu0 %v1105_v33 }
  0xc9   : > { %v1092_v29 = vsel %vm1060_vm6, %v1055_v26, %v570_v27  ;;  %v909_v27 = vrot.slane %v2497_v60, 3 }
  0xca   : > { %783 = vrot.lane.b32.xlu0 %v748_v54, %s2306_s19  ;;  %v623_v37 = vpop.permute.xlu1 %622 }
  0xcb   : > { %v1144_v24 = vsel %vm1097_vm7, %v1092_v29, %v623_v37  ;;  %v910_v29 = vor.u32 %v909_v27, %v908_v8  ;;  %v3228_v8 = vld [vmem:[%s2394_s5 + $0x80] sm:$0xff]  }
  0xcc   : > { %v977_v39 = vpop.permute.xlu0 %976  ;;  %559 = vrot.lane.b32.xlu1 %v524_v38, %s2305_s17  ;;  %v413_v38 = vsel %vm313_vm2, %v408_v12, %v412_v63 }
  0xcd   : > { %v1288_v54 = vsel %vm1097_vm7, %v1237_v58, %v977_v39  ;;  %v528_v39 = vsel %vm501_vm1, %v525_v21, %v527_v1  ;;  %v911_v2 = vsel %vm855_vm3, %v906_v44, %v910_v29 }
  0xce   : > { %836 = vrot.lane.b32.xlu0 %v750_v0, %s2305_s17  ;;  %1653 = vmatprep.mubr.bf16.mxu1 %v1288_v54  ;;  %v469_v48 = vpop.permute.xlu1 %468 }
  0xcf   : > { %1654 = vmatmul.mubr.bf16.gmra.mrb[4].mxu1 %v1144_v24  ;;  %v416_v24 = vor.u32 %v3130_v16, %v412_v63 }
  0xd0   : > { %v770_v46 = vpop.permute.xlu0 %769  ;;  %612 = vrot.lane.b32.xlu1 %v526_v51, %s2307_s20 }
  0xd1   : > { %v1163_v58 = vsel %vm1023_vm5, %v2850_v20, %v770_v46  ;;  %v3218_v20 = vld [vmem:[%s2394_s5 + $0x18] sm:$0xff]  }
  0xd2   : > { %966 = vrot.lane.b32.xlu0 %v907_v43, %s2307_s20  ;;  %v823_v4 = vpop.permute.xlu1 %822  ;;  %v1031_v21 = vsel %vm1023_vm5, %v3218_v20, %v469_v48 }
  0xd3   : > { %v1213_v54 = vsel %vm1060_vm6, %v1163_v58, %v823_v4 }
  0xd4   : > { %v796_v33 = vpop.permute.xlu0 %795  ;;  %484 = vrot.lane.b32.xlu1 %v413_v38, %s2306_s19 }
  0xd5   : > { %v1202_v48 = vsel %vm1023_vm5, %v2864_v50, %v796_v33  ;;  %v530_v50 = vsel %vm501_vm1, %v527_v1, %v529_v42 }
  0xd6   : > { %785 = vrot.lane.b32.xlu0 %v750_v0, %s2306_s19  ;;  %v546_v26 = vpop.permute.xlu1 %545  ;;  %v420_v0 = vrot.slane %v3156_v22, 1 }
  0xd7   : > { %v1068_v46 = vsel %vm1060_vm6, %v1031_v21, %v546_v26 }
  0xd8   : > { %v495_v37 = vpop.permute.xlu0 %494  ;;  %561 = vrot.lane.b32.xlu1 %v526_v51, %s2305_s17  ;;  %v421_v63 = vsel %vm313_vm2, %v416_v24, %v420_v0  ;;  %v754_v24 = vsel %vm725_vm0, %v751_v15, %v753_v31  ;;  %v424_v18 = vor.u32 %v3159_v45, %v420_v0  ;;  %v915_v15 = vsel %vm855_vm3, %v910_v29, %v2878_v23  ;;  %v219_v29 = vld [vmem:[%s2394_s5 + $0x10] sm:$0x8] }
  0xd9   : > { %v1057_v27 = vsel %vm1023_vm5, %v3228_v8, %v495_v37 }
  0xda   : > { %838 = vrot.lane.b32.xlu0 %v752_v25, %s2305_s17  ;;  %v953_v12 = vpop.permute.xlu1 %952 }
  0xdb   : > { %v1252_v51 = vsel %vm1097_vm7, %v1213_v54, %v953_v12 }
  0xdc   : > { %v849_v43 = vpop.permute.xlu0 %848  ;;  %614 = vrot.lane.b32.xlu1 %v528_v39, %s2307_s20  ;;  %1557 = vmatprep.mubr.bf16.mxu0 %v1252_v51 }
  0xdd   : > { %v1239_v54 = vsel %vm1060_vm6, %v1202_v48, %v849_v43 }
  0xde   : > { %968 = vrot.lane.b32.xlu0 %v911_v2, %s2307_s20  ;;  %v599_v38 = vpop.permute.xlu1 %598 }
  0xdf   : > { %v1108_v44 = vsel %vm1097_vm7, %v1068_v46, %v599_v38  ;;  %v2234_v46 = vld [vmem:[%s2394_s5 + $0x14] sm:$0xf] }
  0xe0   : > { %v572_v4 = vpop.permute.xlu0 %571  ;;  %486 = vrot.lane.b32.xlu1 %v421_v63, %s2306_s19  ;;  %1558 = vmatmul.mubr.bf16.gmra.mrb[12].mxu0 %v1108_v44  ;;  %v2001_v38 = vcombine.low %v219_v29, %v2234_v46  ;;  %v993_v46 = vrot.slane %v2770_v17, 3 }
  0xe1   : > { %v1094_v58 = vsel %vm1060_vm6, %v1057_v27, %v572_v4  ;;  %v2235_v4 = vld [vmem:[%s2394_s5 + $0x20] sm:$0xff]  }
  0xe2   : > { %787 = vrot.lane.b32.xlu0 %v752_v25, %s2306_s19  ;;  %v625_v26 = vpop.permute.xlu1 %624  ;;  %v3606_v25 = vrot.slane %v2497_v60, 1 }
  0xe3   : > { %v1147_v2 = vsel %vm1097_vm7, %v1094_v58, %v625_v26  ;;  %v986_v58 = vrot.slane %v2001_v38, 3  ;;  %v987_v26 = vrot.slane %v3218_v20, 3 }
  0xe4   : > { %v979_v12 = vpop.permute.xlu0 %978  ;;  %563 = vrot.lane.b32.xlu1 %v528_v39, %s2305_s17  ;;  %v429_v39 = vsel %vm313_vm2, %v424_v18, %v3606_v25 }
  0xe5   : > { %v1291_v37 = vsel %vm1097_vm7, %v1239_v54, %v979_v12  ;;  %v988_v18 = vsel %vm985_vm8, %v986_v58, %v987_v26  ;;  %v997_v58 = vrot.slane %v2971_v36, 3 }
  0xe6   : > { %840 = vrot.lane.b32.xlu0 %v754_v24, %s2305_s17  ;;  %1661 = vmatprep.mubr.bf16.mxu1 %v1291_v37  ;;  %v471_v31 = vpop.permute.xlu1 %470 }
  0xe7   : > { %1662 = vmatmul.mubr.bf16.gmra.mrb[8].mxu1 %v1147_v2 }
  0xe8   : > { %v772_v33 = vpop.permute.xlu0 %771  ;;  %616 = vrot.lane.b32.xlu1 %v530_v50, %s2307_s20 }
  0xe9   : > { %v1166_v23 = vsel %vm1023_vm5, %v2883_v7, %v772_v33  ;;  %v1033_v7 = vsel %vm1023_vm5, %v2235_v4, %v471_v31  ;;  %v989_v33 = vrot.slane %v2235_v4, 3  ;;  %v995_v4 = vrot.slane %v2897_v13, 3 }
  0xea   : > { %970 = vrot.lane.b32.xlu0 %v915_v15, %s2307_s20  ;;  %v825_v47 = vpop.permute.xlu1 %824 }
  0xeb   : > { %v1215_v43 = vsel %vm1060_vm6, %v1166_v23, %v825_v47 }
  0xec   : > { %v798_v42 = vpop.permute.xlu0 %797  ;;  %488 = vrot.lane.b32.xlu1 %v429_v39, %s2306_s19 }
  0xee   : > { %789 = vrot.lane.b32.xlu0 %v754_v24, %s2306_s19  ;;  %v548_v1 = vpop.permute.xlu1 %547 }
  0xf0   : > { %v497_v0 = vpop.permute.xlu0 %496  ;;  %565 = vrot.lane.b32.xlu1 %v530_v50, %s2305_s17 }
  0xf2   : > { %842 = vrot.lane.b32.xlu0 %v2488_v52, %s2305_s17  ;;  %v955_v51 = vpop.permute.xlu1 %954  ;;  %v1070_v52 = vsel %vm1060_vm6, %v1033_v7, %v548_v1 }
  0xf3   : > { %v1255_v63 = vsel %vm1097_vm7, %v1215_v43, %v955_v51 }
  0xf4   : > { %v851_v21 = vpop.permute.xlu0 %850  ;;  %618 = vrot.lane.b32.xlu1 %v2616_v57, %s2307_s20  ;;  %1565 = vmatprep.mubr.bf16.mxu0 %v1255_v63  ;;  %v3276_v57 = vld [vmem:[%s2394_s5 + $0x88] sm:$0xff]  }
  0xf5   : > { %v1059_v24 = vsel %vm1023_vm5, %v3276_v57, %v497_v0 }
  0xf6   : > { %972 = vrot.lane.b32.xlu0 %v2920_v55, %s2307_s20  ;;  %v601_v44 = vpop.permute.xlu1 %600  ;;  %v1205_v55 = vsel %vm1023_vm5, %v2904_v6, %v798_v42  ;;  %v2237_v6 = vld [vmem:[%s2394_s5 + $0x28] sm:$0xff]   ;;  %v990_v42 = vsel %vm985_vm8, %v987_v26, %v989_v33  ;;  %v999_v26 = vrot.slane %v3011_v34, 3 }
  0xf7   : > { %v1111_v48 = vsel %vm1097_vm7, %v1070_v52, %v601_v44  ;;  %v1241_v2 = vsel %vm1060_vm6, %v1205_v55, %v851_v21  ;;  %v991_v25 = vrot.slane %v2237_v6, 3  ;;  %v996_v44 = vsel %vm985_vm8, %v993_v46, %v995_v4 }
  0xf8   : > { %v574_v27 = vpop.permute.xlu0 %573  ;;  %1566 = vmatmul.mubr.bf16.gmra.mrb[16].mxu0 %v1111_v48 }
  0xf9   : > { %v1096_v54 = vsel %vm1060_vm6, %v1059_v24, %v574_v27  ;;  %v992_v1 = vsel %vm985_vm8, %v989_v33, %v991_v25  ;;  %v994_v52 = vsel %vm985_vm8, %v991_v25, %v993_v46  ;;  %v1003_v25 = vrot.slane %v3071_v32, 3 }
  0xfa   : > { %v627_v12 = vpop.permute.xlu1 %626  ;;  %v673_v46 = vrot.slane %v3047_v19, 2 }
  0xfb   : > { %v1150_v50 = vsel %vm1097_vm7, %v1096_v54, %v627_v12 }
  0xfc   : > { %v981_v37 = vpop.permute.xlu0 %980 }
  0xfd   : > { %v1294_v20 = vsel %vm1097_vm7, %v1241_v2, %v981_v37  ;;  %v668_v2 = vrot.slane %v3023_v5, 1 }
  0xfe   : > { %1669 = vmatprep.mubr.bf16.mxu1 %v1294_v20  ;;  %v473_v31 = vpop.permute.xlu1 %472 }
  0xff   : > { %1670 = vmatmul.mubr.bf16.gmra.mrb[12].mxu1 %v1150_v50  ;;  %v1035_v0 = vsel %vm1023_vm5, %v2237_v6, %v473_v31  ;;  %v669_v31 = vrot.slane %v3020_v41, 2  ;;  %v1001_v6 = vrot.slane %v3036_v3, 3 }
 0x100   : > { %v774_v15 = vpop.permute.xlu0 %773  ;;  %2066 = vmatprep.mubr.msk.bf16.mxu1 %vm1023_vm5, %v988_v18  ;;  %v998_v18 = vsel %vm985_vm8, %v995_v4, %v997_v58  ;;  %v1007_v4 = vrot.slane %v3144_v62, 3 }
 0x101   : > { %v1169_v23 = vsel %vm1023_vm5, %v2963_v11, %v774_v15  ;;  %v670_v33 = vor.u32 %v669_v31, %v668_v2  ;;  %v676_v2 = vrot.slane %v3086_v30, 1 }
 0x102   : > { %v550_v39 = vpop.permute.xlu1 %549 }
 0x103   : > { %v1072_v29 = vsel %vm1060_vm6, %v1035_v0, %v550_v39  ;;  %v671_v41 = vsel %vm631_vm4, %v2995_v59, %v670_v33 }
 0x104   : > { %v827_v47 = vpop.permute.xlu0 %826 }
 0x105   : > { %v1217_v51 = vsel %vm1060_vm6, %v1169_v23, %v827_v47 }
 0x106   : > { %v603_v43 = vpop.permute.xlu1 %602 }
 0x107   : > { %2067 = vmatmul.mubr.msk.bf16.vlgmr.msra.gmra.mrb[16].mxu1 %vm1023_vm5, %v990_v42  ;;  %v1114_v63 = vsel %vm1097_vm7, %v1072_v29, %v603_v43  ;;  %v1002_v42 = vsel %vm985_vm8, %v999_v26, %v1001_v6 }
 0x108   : > { %v957_v21 = vpop.permute.xlu0 %956  ;;  %2070 = vmatprep.mubr.msk.bf16.mxu1 %vm1023_vm5, %v992_v1  ;;  %v1004_v1 = vsel %vm985_vm8, %v1001_v6, %v1003_v25 }
 0x109   : > { %v1258_v38 = vsel %vm1097_vm7, %v1217_v51, %v957_v21  ;;  %v672_v51 = vrot.slane %v3050_v53, 1 }
 0x10a   : > { %1573 = vmatprep.mubr.bf16.mxu0 %v1258_v38  ;;  %v475_v11 = vpop.permute.xlu1 %474 }
 0x10b   : > { %1574 = vmatmul.mubr.bf16.gmra.mrb[20].mxu0 %v1114_v63  ;;  %v1037_v24 = vsel %vm1023_vm5, %v2770_v17, %v475_v11  ;;  %v1000_v17 = vsel %vm985_vm8, %v997_v58, %v999_v26  ;;  %v1009_v58 = vrot.slane %v3197_v35, 3  ;;  %v1011_v26 = vrot.slane %v3174_v9, 3 }
 0x10c   : > { %v776_v7 = vpop.permute.xlu0 %775  ;;  %v677_v35 = vrot.slane %v3083_v40, 2 }
 0x10d   : > { %v1172_v55 = vsel %vm1023_vm5, %v3002_v49, %v776_v7  ;;  %v674_v7 = vor.u32 %v673_v46, %v672_v51  ;;  %v2239_v51 = vld [vmem:[%s2394_s5 + $0x98] sm:$0xff]  }
 0x10e   : > { %v552_v27 = vpop.permute.xlu1 %551 }
 0x10f   : > { %2071 = vmatmul.mubr.msk.bf16.gmra.mrb[20].mxu1 %vm1023_vm5, %v994_v52  ;;  %v1074_v54 = vsel %vm1060_vm6, %v1037_v24, %v552_v27  ;;  %v675_v27 = vsel %vm631_vm4, %v670_v33, %v674_v7 }
 0x110   : > { %v829_v48 = vpop.permute.xlu0 %828  ;;  %2074 = vmatprep.mubr.msk.bf16.mxu1 %vm1023_vm5, %v996_v44 }
 0x111   : > { %v1219_v37 = vsel %vm1060_vm6, %v1172_v55, %v829_v48 }
 0x112   : > { %v605_v12 = vpop.permute.xlu1 %604 }
 0x113   : > { %v1117_v20 = vsel %vm1097_vm7, %v1074_v54, %v605_v12 }
 0x114   : > { %v959_v50 = vpop.permute.xlu0 %958 }
 0x115   : > { %v1261_v15 = vsel %vm1097_vm7, %v1219_v37, %v959_v50 }
 0x116   : > { %1581 = vmatprep.mubr.bf16.mxu0 %v1261_v15  ;;  %v477_v49 = vpop.permute.xlu1 %476  ;;  %v678_v15 = vor.u32 %v677_v35, %v676_v2 }
 0x117   : > { %1582 = vmatmul.mubr.bf16.gmra.mrb[24].mxu0 %v1117_v20  ;;  %2075 = vmatmul.mubr.msk.bf16.gmra.mrb[24].mxu1 %vm1023_vm5, %v998_v18  ;;  %v1039_v0 = vsel %vm1023_vm5, %v2897_v13, %v477_v49  ;;  %v1005_v13 = vrot.slane %v3112_v14, 3  ;;  %v1010_v18 = vsel %vm985_vm8, %v1007_v4, %v1009_v58  ;;  %v1015_v49 = vrot.slane %v3276_v57, 3 }
 0x118   : > { %v778_v5 = vpop.permute.xlu0 %777  ;;  %2078 = vmatprep.mubr.msk.bf16.mxu1 %vm1023_vm5, %v1000_v17  ;;  %v1013_v17 = vrot.slane %v3228_v8, 3  ;;  %v679_v40 = vsel %vm631_vm4, %v674_v7, %v678_v15  ;;  %v680_v57 = vrot.slane %v3130_v16, 1 }
 0x119   : > { %v1175_v23 = vsel %vm1023_vm5, %v671_v41, %v778_v5  ;;  %v1006_v52 = vsel %vm985_vm8, %v1003_v25, %v1005_v13  ;;  %v1008_v44 = vsel %vm985_vm8, %v1005_v13, %v1007_v4 }
 0x11a   : > { %v554_v39 = vpop.permute.xlu1 %553  ;;  %v1014_v6 = vsel %vm985_vm8, %v1011_v26, %v1013_v17  ;;  %v1016_v25 = vsel %vm985_vm8, %v1013_v17, %v1015_v49 }
 0x11b   : > { %v1076_v29 = vsel %vm1060_vm6, %v1039_v0, %v554_v39 }
 0x11c   : > { %v831_v47 = vpop.permute.xlu0 %830 }
 0x11d   : > { %v1221_v21 = vsel %vm1060_vm6, %v1175_v23, %v831_v47  ;;  %v681_v23 = vrot.slane %v3127_v28, 2 }
 0x11e   : > { %v607_v43 = vpop.permute.xlu1 %606 }
 0x11f   : > { %2079 = vmatmul.mubr.msk.bf16.gmra.mrb[28].mxu1 %vm1023_vm5, %v1002_v42  ;;  %v1120_v63 = vsel %vm1097_vm7, %v1076_v29, %v607_v43  ;;  %v2238_v29 = vld [vmem:[%s2394_s5 + $0x90] sm:$0xff]   ;;  %s161_s5 = sand.u32 1, %s2294_s13  }
 0x120   : > { %v961_v59 = vpop.permute.xlu0 %960  ;;  %2082 = vmatprep.mubr.msk.bf16.mxu1 %vm1023_vm5, %v1004_v1  ;;  %s2134_s17 = smul.u32 288, %s161_s5  ;;  %s3558_s16 = scalar_lea.sflag [#allocation3], %s161_s5 }
 0x121   : > { %v1264_v38 = vsel %vm1097_vm7, %v1221_v21, %v961_v59  ;;  %v1019_v21 = vrot.slane %v2239_v51, 3 }
 0x122   : > { %1589 = vmatprep.mubr.bf16.mxu0 %v1264_v38  ;;  %v479_v11 = vpop.permute.xlu1 %478  ;;  %s3451_s10 = scalar_lea.vmem [#allocation2], %s2134_s17 }
 0x123   : > { %1590 = vmatmul.mubr.bf16.gmra.mrb[28].mxu0 %v1120_v63  ;;  %v1041_v24 = vsel %vm1023_vm5, %v2971_v36, %v479_v11  ;;  %v1012_v36 = vsel %vm985_vm8, %v1009_v58, %v1011_v26  ;;  %v682_v63 = vor.u32 %v681_v23, %v680_v57  ;;  %v1021_v11 = vrot.slane %v2938_v61, 3  ;;  %s1905_s24 = sshll.u32 %s3451_s10, 4  ;;  %s3551_s24 = int_to_ptr.vmem [resolvable:$true] %s1905_s24 }
 0x124   : > { %v780_v53 = vpop.permute.xlu0 %779  ;;  %s2240_s28 = scalar_lea.vmem %s3551_s24, 4608  ;;  %p2247_p0 = scmp.lt.s32.totalorder %s3551_s24, %s2245_s30 }
 0x125   : > { %v1178_v55 = vsel %vm1023_vm5, %v675_v27, %v780_v53  ;;  %v683_v38 = vsel %vm631_vm4, %v678_v15, %v682_v63  ;;  %v1022_v26 = vsel %vm985_vm8, %v1019_v21, %v1021_v11  ;;  %p2241_p11 = scmp.ne.s32.totalorder %s3551_s24, %s2240_s28  ;;  %p2248_p1 = scmp.lt.s32.totalorder %s2246_s4, %s2240_s28 }
 0x126   : > { %v556_v19 = vpop.permute.xlu1 %555 }
 0x127   : > { %2083 = vmatmul.mubr.msk.bf16.gmra.mrb[32].mxu1 %vm1023_vm5, %v1006_v52  ;;  %v1078_v54 = vsel %vm1060_vm6, %v1041_v24, %v556_v19  ;;  %v684_v19 = vrot.slane %v3159_v45, 1  ;;  %v685_v24 = vrot.slane %v3156_v22, 2  ;;  %p2242_p12 = pnand %p2241_p11, %p2369_p5  ;;  %p2249_p2 = por %p2248_p1, %p2247_p0 }
 0x128   : > { %v833_v48 = vpop.permute.xlu0 %832  ;;  %2086 = vmatprep.mubr.msk.bf16.mxu1 %vm1023_vm5, %v1008_v44 }
 0x129   : > { %v1223_v37 = vsel %vm1060_vm6, %v1178_v55, %v833_v48  ;;  %v686_v55 = vor.u32 %v685_v24, %v684_v19  ;;  %p2243_p13 = pneg %p2242_p12 }
 0x12a   : > { %v609_v12 = vpop.permute.xlu1 %608 }
 0x12b   : > { %v1123_v20 = vsel %vm1097_vm7, %v1078_v54, %v609_v12  ;;  %v687_v45 = vsel %vm631_vm4, %v682_v63, %v686_v55  ;;  %p2250_p3 = pnand %p2249_p2, %p2243_p13 }
 0x12c   : > { %v963_v50 = vpop.permute.xlu0 %962 }
 0x12d   : > { %v1267_v9 = vsel %vm1097_vm7, %v1223_v37, %v963_v50 }
 0x12e   : > { %1597 = vmatprep.mubr.bf16.mxu0 %v1267_v9  ;;  %v481_v31 = vpop.permute.xlu1 %480 }
 0x12f   : > { %1598 = vmatmul.mubr.bf16.gmra.mrb[32].mxu0 %v1123_v20  ;;  %2087 = vmatmul.mubr.msk.bf16.gmra.mrb[36].mxu1 %vm1023_vm5, %v1010_v18  ;;  %v1043_v39 = vsel %vm1023_vm5, %v3011_v34, %v481_v31  ;;  %v1017_v34 = vrot.slane %v2238_v29, 3  ;;  %v689_v31 = vrot.slane %v2497_v60, 2 }
 0x130   : > { %v782_v30 = vpop.permute.xlu0 %781  ;;  %2090 = vmatprep.mubr.msk.bf16.mxu1 %vm1023_vm5, %v1012_v36  ;;  %v688_v36 = vrot.slane %v2522_v10, 1 }
 0x131   : > { %v1181_v41 = vsel %vm1023_vm5, %v679_v40, %v782_v30  ;;  %v1018_v46 = vsel %vm985_vm8, %v1015_v49, %v1017_v34  ;;  %v1020_v13 = vsel %vm985_vm8, %v1017_v34, %v1019_v21 }
 0x132   : > { %v558_v33 = vpop.permute.xlu1 %557 }
 0x133   : > { %v1080_v47 = vsel %vm1060_vm6, %v1043_v39, %v558_v33 }
 0x134   : > { %v835_v5 = vpop.permute.xlu0 %834 }
 0x135   : > { %v1225_v42 = vsel %vm1060_vm6, %v1181_v41, %v835_v5 }
 0x136   : > { %v611_v8 = vpop.permute.xlu1 %610 }
 0x137   : > { %2091 = vmatmul.mubr.msk.bf16.gmra.mrb[40].mxu1 %vm1023_vm5, %v1014_v6  ;;  %v1126_v0 = vsel %vm1097_vm7, %v1080_v47, %v611_v8 }
 0x138   : > { %v965_v1 = vpop.permute.xlu0 %964  ;;  %2094 = vmatprep.mubr.msk.bf16.mxu1 %vm1023_vm5, %v1016_v25 }
 0x139   : > { %v1270_v43 = vsel %vm1097_vm7, %v1225_v42, %v965_v1 }
 0x13a   : > { %1605 = vmatprep.mubr.bf16.mxu0 %v1270_v43  ;;  %v483_v59 = vpop.permute.xlu1 %482 }
 0x13b   : > { %1606 = vmatmul.mubr.bf16.gmra.mrb[36].mxu0 %v1126_v0  ;;  %v1045_v7 = vsel %vm1023_vm5, %v3036_v3, %v483_v59 }
 0x13c   : > { %v784_v16 = vpop.permute.xlu0 %783 }
 0x13d   : > { %v1184_v53 = vsel %vm1023_vm5, %v683_v38, %v784_v16 }
 0x13e   : > { %v560_v28 = vpop.permute.xlu1 %559 }
 0x13f   : > { %2095 = vmatmul.mubr.msk.bf16.gmra.mrb[44].mxu1 %vm1023_vm5, %v1018_v46  ;;  %v1082_v52 = vsel %vm1060_vm6, %v1045_v7, %v560_v28 }
 0x140   : > { %v837_v4 = vpop.permute.xlu0 %836  ;;  %2098 = vmatprep.mubr.msk.bf16.mxu1 %vm1023_vm5, %v1020_v13 }
 0x141   : > { %v1227_v27 = vsel %vm1060_vm6, %v1184_v53, %v837_v4 }
 0x142   : > { %v613_v44 = vpop.permute.xlu1 %612 }
 0x143   : > { %v1129_v58 = vsel %vm1097_vm7, %v1082_v52, %v613_v44 }
 0x144   : > { %v967_v48 = vpop.permute.xlu0 %966 }
 0x145   : > { %v1273_v61 = vsel %vm1097_vm7, %v1227_v27, %v967_v48 }
 0x146   : > { %1613 = vmatprep.mubr.bf16.mxu0 %v1273_v61  ;;  %v485_v3 = vpop.permute.xlu1 %484 }
 0x147   : > { %1614 = vmatmul.mubr.bf16.gmra.mrb[40].mxu0 %v1129_v58  ;;  %2099 = vmatmul.mubr.msk.bf16.gmra.mrb[48].mxu1 %vm1023_vm5, %v1022_v26  ;;  %v1047_v37 = vsel %vm1023_vm5, %v3071_v32, %v485_v3  ;;  %v690_v32 = vor.u32 %v689_v31, %v688_v36 }
 0x148   : > { %v786_v54 = vpop.permute.xlu0 %785 }
 0x149   : > { %v1187_v50 = vsel %vm1023_vm5, %v687_v45, %v786_v54  ;;  %v691_v33 = vsel %vm631_vm4, %v686_v55, %v690_v32 }
 0x14a   : > { %v562_v12 = vpop.permute.xlu1 %561 }
 0x14b   : > { %v1084_v22 = vsel %vm1060_vm6, %v1047_v37, %v562_v12 }
 0x14c   : > { %v839_v2 = vpop.permute.xlu0 %838 }
 0x14d   : > { %v1229_v18 = vsel %vm1060_vm6, %v1187_v50, %v839_v2 }
 0x14e   : > { %v615_v20 = vpop.permute.xlu1 %614 }
 0x14f   : > { %v1132_v9 = vsel %vm1097_vm7, %v1084_v22, %v615_v20 }
 0x150   : > { %v969_v35 = vpop.permute.xlu0 %968 }
 0x151   : > { %v1276_v15 = vsel %vm1097_vm7, %v1229_v18, %v969_v35 }
 0x152   : > { %1621 = vmatprep.mubr.bf16.mxu0 %v1276_v15  ;;  %v487_v30 = vpop.permute.xlu1 %486  ;;  %v3445_v15 = vld [vmem:[%s3601_s2] ss:$0 sm:$0xff] }
 0x153   : > { %1622 = vmatmul.mubr.bf16.gmra.mrb[44].mxu0 %v1132_v9  ;;  %v1049_v5 = vsel %vm1023_vm5, %v3112_v14, %v487_v30  ;;  %v695_v14 = vsel %vm631_vm4, %v690_v32, %v2744_v56 }
 0x154   : > { %v788_v17 = vpop.permute.xlu0 %787 }
 0x155   : > { %v1190_v6 = vsel %vm1023_vm5, %v691_v33, %v788_v17 }
 0x156   : > { %v564_v49 = vpop.permute.xlu1 %563 }
 0x157   : > { %v1086_v10 = vsel %vm1060_vm6, %v1049_v5, %v564_v49 }
 0x158   : > { %v841_v40 = vpop.permute.xlu0 %840 }
 0x159   : > { %v1231_v60 = vsel %vm1060_vm6, %v1190_v6, %v841_v40 }
 0x15a   : > { %v617_v25 = vpop.permute.xlu1 %616 }
 0x15b   : > { %v1135_v41 = vsel %vm1097_vm7, %v1086_v10, %v617_v25 }
 0x15c   : > { %v971_v39 = vpop.permute.xlu0 %970 }
 0x15d   : > { %v1279_v47 = vsel %vm1097_vm7, %v1231_v60, %v971_v39 }
 0x15e   : > { %1629 = vmatprep.mubr.bf16.mxu0 %v1279_v47  ;;  %v489_v8 = vpop.permute.xlu1 %488 }
 0x15f   : > { %1630 = vmatmul.mubr.bf16.gmra.mrb[48].mxu0 %v1135_v41  ;;  %v1051_v0 = vsel %vm1023_vm5, %v3144_v62, %v489_v8 }
 0x160   : > { %v790_v57 = vpop.permute.xlu0 %789 }
 0x161   : > { %v1193_v23 = vsel %vm1023_vm5, %v695_v14, %v790_v57 }
 0x162   : > { %v566_v42 = vpop.permute.xlu1 %565 }
 0x163   : > { %v1088_v29 = vsel %vm1060_vm6, %v1051_v0, %v566_v42 }
 0x164   : > { %v843_v1 = vpop.permute.xlu0 %842 }
 0x165   : > { %v1233_v43 = vsel %vm1060_vm6, %v1193_v23, %v843_v1 }
 0x166   : > { %v619_v34 = vpop.permute.xlu1 %618 }
 0x167   : > { %v1138_v21 = vsel %vm1097_vm7, %v1088_v29, %v619_v34 }
 0x168   : > { %v973_v51 = vpop.permute.xlu0 %972 }
 0x169   : > { %v1282_v59 = vsel %vm1097_vm7, %v1233_v43, %v973_v51 }
 0x16a   : > { %1637 = vmatprep.mubr.bf16.mxu0 %v1282_v59 }
 0x16b   : > { %1638 = vmatmul.mubr.bf16.gmra.mrb[52].mxu0 %v1138_v21 }
 0x17a   : > { %v1535_v63 = vpop.f32.mrb[0].mxu0 }
 0x17b   : > { %v1537_v56 = vpop.f32.mrb[1].mxu0  ;;  %v1536_v32 = vadd.f32 %v3445_v15, %v1535_v63 }
 0x17c   : > { %v1538_v16 = vpop.f32.mrb[2].mxu0 }
 0x17d   : > { %v1540_v46 = vpop.f32.mrb[3].mxu0  ;;  %v1539_v5 = vadd.f32 %v3445_v15, %v1538_v16 }
 0x183   : > { %v1543_v13 = vpop.f32.mrb[4].mxu0 }
 0x184   : > { %v1545_v62 = vpop.f32.mrb[5].mxu0  ;;  %v1544_v30 = vadd.f32 %v3445_v15, %v1543_v13 }
 0x185   : > { %v1546_v28 = vpop.f32.mrb[6].mxu0 }
 0x186   : > { %v1548_v38 = vpop.f32.mrb[7].mxu0  ;;  %v1547_v49 = vadd.f32 %v3445_v15, %v1546_v28 }
 0x18a   : > { %v3423_v4 = vpop.f32.mrb[0].mxu1 }
 0x18b   : > { %v1649_v11 = vpop.f32.mrb[1].mxu1 }
 0x18c   : > { %v3425_v7 = vpop.f32.mrb[2].mxu1 }
 0x18d   : > { %v1652_v53 = vpop.f32.mrb[3].mxu1 }
 0x19b   : > { %v1551_v52 = vpop.f32.mrb[8].mxu0 }
 0x19c   : > { %v1553_v44 = vpop.f32.mrb[9].mxu0  ;;  %v1552_v14 = vadd.f32 %v3445_v15, %v1551_v52 }
 0x19d   : > { %v1554_v19 = vpop.f32.mrb[10].mxu0 }
 0x19e   : > { %v1556_v27 = vpop.f32.mrb[11].mxu0  ;;  %v1555_v34 = vadd.f32 %v3445_v15, %v1554_v19 }
 0x1a2   : > { %v3427_v48 = vpop.f32.mrb[4].mxu1 }
 0x1a3   : > { %v1657_v58 = vpop.f32.mrb[5].mxu1 }
 0x1a4   : > { %v3429_v26 = vpop.f32.mrb[6].mxu1 }
 0x1a5   : > { %v1660_v24 = vpop.f32.mrb[7].mxu1 }
 0x1b3   : > { %v1559_v61 = vpop.f32.mrb[12].mxu0 }
 0x1b4   : > { %v1561_v3 = vpop.f32.mrb[13].mxu0  ;;  %v1560_v57 = vadd.f32 %v3445_v15, %v1559_v61 }
 0x1b5   : > { %v1562_v55 = vpop.f32.mrb[14].mxu0 }
 0x1b6   : > { %v1564_v54 = vpop.f32.mrb[15].mxu0  ;;  %v1563_v0 = vadd.f32 %v3445_v15, %v1562_v55 }
 0x1ba   : > { %v3431_v12 = vpop.f32.mrb[8].mxu1 }
 0x1bb   : > { %v1665_v45 = vpop.f32.mrb[9].mxu1 }
 0x1bc   : > { %v3433_v2 = vpop.f32.mrb[10].mxu1 }
 0x1bd   : > { %v1668_v37 = vpop.f32.mrb[11].mxu1 }
 0x1cb   : > { %v1567_v50 = vpop.f32.mrb[16].mxu0 }
 0x1cc   : > { %v1569_v22 = vpop.f32.mrb[17].mxu0  ;;  %v1568_v16 = vadd.f32 %v3445_v15, %v1567_v50 }
 0x1cd   : > { %v1570_v20 = vpop.f32.mrb[18].mxu0 }
 0x1ce   : > { %v1572_v18 = vpop.f32.mrb[19].mxu0  ;;  %v1571_v53 = vadd.f32 %v3445_v15, %v1570_v20 }
 0x1d2   : > { %v3435_v35 = vpop.f32.mrb[12].mxu1 }
 0x1d3   : > { %v1673_v9 = vpop.f32.mrb[13].mxu1 }
 0x1d4   : > { %v3438_v36 = vpop.f32.mrb[14].mxu1 }
 0x1d5   : > { %v1676_v31 = vpop.f32.mrb[15].mxu1 }
 0x1da   : > { %v2068_v17 = vpop.f32.mrb[16].mxu1 }
 0x1db   : > { %v1721_v33 = vadd.f32 %v2068_v17, %v1544_v30  ;;  %v1712_v40 = vpop.f32.mrb[17].mxu1 }
 0x1dc   : > { %v1713_v6 = vadd.f32 %v1712_v40, %v1536_v32  ;;  %v2069_v10 = vpop.f32.mrb[18].mxu1 }
 0x1dd   : > { %1857 = vst [vmem:[%s3451_s10 + $0x10] sm:$0xff] %v1721_v33  ;;  %v1724_v25 = vadd.f32 %v2069_v10, %v1547_v49  ;;  %v1715_v60 = vpop.f32.mrb[19].mxu1 }
 0x1de   : > { %1855 = vst [vmem:[%s3451_s10] sm:$0xff] %v1713_v6  ;;  %v1716_v39 = vadd.f32 %v1715_v60, %v1539_v5  ;;  %v1575_v41 = vpop.f32.mrb[20].mxu0 }
 0x1df   : > { %1858 = vst [vmem:[%s3451_s10 + $0x18] sm:$0xff] %v1724_v25  ;;  %v1577_v47 = vpop.f32.mrb[21].mxu0  ;;  %v1576_v56 = vadd.f32 %v3445_v15, %v1575_v41 }
 0x1e0   : > { %1856 = vst [vmem:[%s3451_s10 + $0x8] sm:$0xff] %v1716_v39  ;;  %v1578_v8 = vpop.f32.mrb[22].mxu0 }
 0x1e1   : > { %v1580_v42 = vpop.f32.mrb[23].mxu0  ;;  %v1579_v62 = vadd.f32 %v3445_v15, %v1578_v8 }
 0x1e2   : > { %v2072_v1 = vpop.f32.mrb[20].mxu1 }
 0x1e3   : > { %v1737_v23 = vadd.f32 %v2072_v1, %v1560_v57  ;;  %v1728_v29 = vpop.f32.mrb[21].mxu1 }
 0x1e4   : > { %v1729_v43 = vadd.f32 %v1728_v29, %v1552_v14  ;;  %v2073_v51 = vpop.f32.mrb[22].mxu1 }
 0x1e5   : > { %1861 = vst [vmem:[%s3451_s10 + $0x30] sm:$0xff] %v1737_v23  ;;  %v1740_v21 = vadd.f32 %v2073_v51, %v1563_v0  ;;  %v1731_v59 = vpop.f32.mrb[23].mxu1 }
 0x1e6   : > { %1859 = vst [vmem:[%s3451_s10 + $0x20] sm:$0xff] %v1729_v43  ;;  %v1732_v63 = vadd.f32 %v1731_v59, %v1555_v34 }
 0x1e7   : > { %1862 = vst [vmem:[%s3451_s10 + $0x38] sm:$0xff] %v1740_v21 }
 0x1e8   : > { %1860 = vst [vmem:[%s3451_s10 + $0x28] sm:$0xff] %v1732_v63 }
 0x1ea   : > { %v1583_v46 = vpop.f32.mrb[24].mxu0  ;;  %v2076_v13 = vpop.f32.mrb[24].mxu1 }
 0x1eb   : > { %v1753_v28 = vadd.f32 %v2076_v13, %v1576_v56  ;;  %v1585_v38 = vpop.f32.mrb[25].mxu0  ;;  %v1744_v11 = vpop.f32.mrb[25].mxu1  ;;  %v1584_v3 = vadd.f32 %v3445_v15, %v1583_v46 }
 0x1ec   : > { %v1745_v52 = vadd.f32 %v1744_v11, %v1568_v16  ;;  %v1586_v44 = vpop.f32.mrb[26].mxu0  ;;  %v2077_v19 = vpop.f32.mrb[26].mxu1  ;;  %v1656_v16 = vadd.f32 %v3445_v15, %v3427_v48  ;;  %v1659_v11 = vadd.f32 %v3445_v15, %v3429_v26  ;;  %v1651_v48 = vadd.f32 %v3445_v15, %v3425_v7 }
 0x1ed   : > { %1865 = vst [vmem:[%s3451_s10 + $0x50] sm:$0xff] %v1753_v28  ;;  %v1756_v27 = vadd.f32 %v2077_v19, %v1579_v62  ;;  %v1588_v58 = vpop.f32.mrb[27].mxu0  ;;  %v1747_v24 = vpop.f32.mrb[27].mxu1  ;;  %v1587_v45 = vadd.f32 %v3445_v15, %v1586_v44  ;;  %v1648_v28 = vadd.f32 %v3445_v15, %v3423_v4  ;;  %v1672_v26 = vadd.f32 %v3445_v15, %v3435_v35 }
 0x1ee   : > { %1863 = vst [vmem:[%s3451_s10 + $0x40] sm:$0xff] %v1745_v52  ;;  %v1748_v61 = vadd.f32 %v1747_v24, %v1571_v53  ;;  %v1675_v7 = vadd.f32 %v3445_v15, %v3438_v36  ;;  %v1667_v35 = vadd.f32 %v3445_v15, %v3433_v2 }
 0x1ef   : > { %1866 = vst [vmem:[%s3451_s10 + $0x58] sm:$0xff] %v1756_v27 }
 0x1f0   : > { %1864 = vst [vmem:[%s3451_s10 + $0x48] sm:$0xff] %v1748_v61  ;;  %v1664_v61 = vadd.f32 %v3445_v15, %v3431_v12 }
 0x1f2   : > { %v2080_v55 = vpop.f32.mrb[28].mxu1 }
 0x1f3   : > { %v1760_v54 = vpop.f32.mrb[29].mxu1 }
 0x1f4   : > { %v1761_v37 = vadd.f32 %v1760_v54, %v1584_v3  ;;  %v2081_v50 = vpop.f32.mrb[30].mxu1 }
 0x1f5   : > { %v1763_v22 = vpop.f32.mrb[31].mxu1 }
 0x1f6   : > { %1867 = vst [vmem:[%s3451_s10 + $0x60] sm:$0xff] %v1761_v37  ;;  %v1764_v20 = vadd.f32 %v1763_v22, %v1587_v45  ;;  %v1591_v18 = vpop.f32.mrb[28].mxu0 }
 0x1f7   : > { %v1592_v9 = vadd.f32 %v3445_v15, %v1591_v18  ;;  %v1593_v31 = vpop.f32.mrb[29].mxu0 }
 0x1f8   : > { %1868 = vst [vmem:[%s3451_s10 + $0x68] sm:$0xff] %v1764_v20  ;;  %v1594_v30 = vpop.f32.mrb[30].mxu0 }
 0x1f9   : > { %v1769_v32 = vadd.f32 %v2080_v55, %v1592_v9  ;;  %v1595_v17 = vadd.f32 %v3445_v15, %v1594_v30  ;;  %v1596_v49 = vpop.f32.mrb[31].mxu0 }
 0x1fa   : > { %v2084_v33 = vpop.f32.mrb[32].mxu1 }
 0x1fb   : > { %1869 = vst [vmem:[%s3451_s10 + $0x70] sm:$0xff] %v1769_v32  ;;  %v1772_v40 = vadd.f32 %v2081_v50, %v1595_v17  ;;  %v1776_v5 = vpop.f32.mrb[33].mxu1 }
 0x1fc   : > { %v2085_v6 = vpop.f32.mrb[34].mxu1 }
 0x1fd   : > { %1870 = vst [vmem:[%s3451_s10 + $0x78] sm:$0xff] %v1772_v40  ;;  %v1779_v10 = vpop.f32.mrb[35].mxu1 }
 0x202   : > { %v1599_v25 = vpop.f32.mrb[32].mxu0  ;;  %v3481_v60 = vpop.f32.mrb[36].mxu1 }
 0x203   : > { %v1600_v39 = vadd.f32 %v3445_v15, %v1599_v25  ;;  %v1601_v41 = vpop.f32.mrb[33].mxu0  ;;  %v1792_v47 = vpop.f32.mrb[37].mxu1 }
 0x204   : > { %v1602_v8 = vpop.f32.mrb[34].mxu0  ;;  %v3484_v57 = vpop.f32.mrb[38].mxu1 }
 0x205   : > { %v1603_v42 = vadd.f32 %v3445_v15, %v1602_v8  ;;  %v1777_v14 = vadd.f32 %v1776_v5, %v1600_v39  ;;  %v1604_v1 = vpop.f32.mrb[35].mxu0  ;;  %v1795_v0 = vpop.f32.mrb[39].mxu1 }
 0x207   : > { %1871 = vst [vmem:[%s3451_s10 + $0x80] sm:$0xff] %v1777_v14  ;;  %v1780_v23 = vadd.f32 %v1779_v10, %v1603_v42 }
 0x209   : > { %1872 = vst [vmem:[%s3451_s10 + $0x88] sm:$0xff] %v1780_v23 }
 0x20a   : > { %v3489_v29 = vpop.f32.mrb[40].mxu1 }
 0x20b   : > { %v3491_v34 = vpop.f32.mrb[41].mxu1 }
 0x20c   : > { %v3493_v43 = vpop.f32.mrb[42].mxu1 }
 0x20d   : > { %v3495_v51 = vpop.f32.mrb[43].mxu1 }
 0x20e   : > { %v1607_v21 = vpop.f32.mrb[36].mxu0 }
 0x20f   : > { %v1608_v59 = vadd.f32 %v3445_v15, %v1607_v21  ;;  %v1609_v63 = vpop.f32.mrb[37].mxu0 }
 0x210   : > { %v1610_v56 = vpop.f32.mrb[38].mxu0 }
 0x211   : > { %v1785_v46 = vadd.f32 %v2084_v33, %v1608_v59  ;;  %v1611_v13 = vadd.f32 %v3445_v15, %v1610_v56  ;;  %v1612_v62 = vpop.f32.mrb[39].mxu0 }
 0x212   : > { %v2096_v38 = vpop.f32.mrb[44].mxu1 }
 0x213   : > { %1873 = vst [vmem:[%s3451_s10 + $0x90] sm:$0xff] %v1785_v46  ;;  %v1788_v53 = vadd.f32 %v2085_v6, %v1611_v13  ;;  %v1833_v52 = vadd.f32 %v2096_v38, %v1656_v16  ;;  %v1824_v44 = vpop.f32.mrb[45].mxu1 }
 0x214   : > { %v1825_v19 = vadd.f32 %v1824_v44, %v1648_v28  ;;  %v2097_v27 = vpop.f32.mrb[46].mxu1 }
 0x215   : > { %1874 = vst [vmem:[%s3451_s10 + $0x98] sm:$0xff] %v1788_v53  ;;  %1885 = vst [vmem:[%s3451_s10 + $0xf0] sm:$0xff] %v1833_v52  ;;  %v1836_v58 = vadd.f32 %v2097_v27, %v1659_v11  ;;  %v1827_v24 = vpop.f32.mrb[47].mxu1 }
 0x216   : > { %1883 = vst [vmem:[%s3451_s10 + $0xe0] sm:$0xff] %v1825_v19  ;;  %v1828_v4 = vadd.f32 %v1827_v24, %v1651_v48 }
 0x217   : > { %1886 = vst [vmem:[%s3451_s10 + $0xf8] sm:$0xff] %v1836_v58 }
 0x218   : > { %1884 = vst [vmem:[%s3451_s10 + $0xe8] sm:$0xff] %v1828_v4 }
 0x21a   : > { %v1615_v3 = vpop.f32.mrb[40].mxu0  ;;  %v2100_v55 = vpop.f32.mrb[48].mxu1 }
 0x21b   : > { %v1616_v54 = vadd.f32 %v3445_v15, %v1615_v3  ;;  %v1849_v45 = vadd.f32 %v2100_v55, %v1672_v26  ;;  %v1617_v37 = vpop.f32.mrb[41].mxu0  ;;  %v1840_v50 = vpop.f32.mrb[49].mxu1 }
 0x21c   : > { %v1841_v22 = vadd.f32 %v1840_v50, %v1664_v61  ;;  %v1618_v12 = vpop.f32.mrb[42].mxu0  ;;  %v2101_v20 = vpop.f32.mrb[50].mxu1 }
 0x21d   : > { %v1793_v18 = vadd.f32 %v1792_v47, %v1616_v54  ;;  %1889 = vst [vmem:[%s3451_s10 + $0x110] sm:$0xff] %v1849_v45  ;;  %v1619_v9 = vadd.f32 %v3445_v15, %v1618_v12  ;;  %v1852_v36 = vadd.f32 %v2101_v20, %v1675_v7  ;;  %v1620_v31 = vpop.f32.mrb[43].mxu0  ;;  %v1843_v30 = vpop.f32.mrb[51].mxu1 }
 0x21e   : > { %1887 = vst [vmem:[%s3451_s10 + $0x100] sm:$0xff] %v1841_v22  ;;  %v1844_v32 = vadd.f32 %v1843_v30, %v1667_v35 }
 0x21f   : > { %1875 = vst [vmem:[%s3451_s10 + $0xa0] sm:$0xff] %v1793_v18  ;;  %v1796_v17 = vadd.f32 %v1795_v0, %v1619_v9  ;;  %1890 = vst [vmem:[%s3451_s10 + $0x118] sm:$0xff] %v1852_v36 }
 0x220   : > { %1888 = vst [vmem:[%s3451_s10 + $0x108] sm:$0xff] %v1844_v32 }
 0x221   : > { %1876 = vst [vmem:[%s3451_s10 + $0xa8] sm:$0xff] %v1796_v17 }
 0x226   : > { %v1623_v2 = vpop.f32.mrb[44].mxu0 }
 0x227   : > { %v1624_v49 = vadd.f32 %v3445_v15, %v1623_v2  ;;  %v1625_v33 = vpop.f32.mrb[45].mxu0 }
 0x228   : > { %v1626_v40 = vpop.f32.mrb[46].mxu0 }
 0x229   : > { %v1801_v5 = vadd.f32 %v3481_v60, %v1624_v49  ;;  %v1627_v6 = vadd.f32 %v3445_v15, %v1626_v40  ;;  %v1628_v10 = vpop.f32.mrb[47].mxu0 }
 0x22b   : > { %1877 = vst [vmem:[%s3451_s10 + $0xb0] sm:$0xff] %v1801_v5  ;;  %v1804_v25 = vadd.f32 %v3484_v57, %v1627_v6 }
 0x22d   : > { %1878 = vst [vmem:[%s3451_s10 + $0xb8] sm:$0xff] %v1804_v25 }
 0x232   : > { %v1631_v39 = vpop.f32.mrb[48].mxu0 }
 0x233   : > { %v1632_v41 = vadd.f32 %v3445_v15, %v1631_v39  ;;  %v1633_v47 = vpop.f32.mrb[49].mxu0 }
 0x234   : > { %v1634_v8 = vpop.f32.mrb[50].mxu0 }
 0x235   : > { %v1809_v42 = vadd.f32 %v3491_v34, %v1632_v41  ;;  %v1635_v14 = vadd.f32 %v3445_v15, %v1634_v8  ;;  %v1636_v60 = vpop.f32.mrb[51].mxu0 }
 0x237   : > { %1879 = vst [vmem:[%s3451_s10 + $0xc0] sm:$0xff] %v1809_v42  ;;  %v1812_v1 = vadd.f32 %v3495_v51, %v1635_v14 }
 0x239   : > { %1880 = vst [vmem:[%s3451_s10 + $0xc8] sm:$0xff] %v1812_v1 }
 0x23e   : > { %v1639_v57 = vpop.f32.mrb[52].mxu0 }
 0x23f   : > { %v1640_v0 = vadd.f32 %v3445_v15, %v1639_v57  ;;  %v1641_v23 = vpop.f32.mrb[53].mxu0 }
 0x240   : > { %v1642_v21 = vpop.f32.mrb[54].mxu0 }
 0x241   : > { %v1817_v34 = vadd.f32 %v3489_v29, %v1640_v0  ;;  %v1643_v59 = vadd.f32 %v3445_v15, %v1642_v21  ;;  %v1644_v63 = vpop.f32.mrb[55].mxu0 }
 0x243   : > { %1881 = vst [vmem:[%s3451_s10 + $0xd0] sm:$0xff] %v1817_v34  ;;  %v1820_v51 = vadd.f32 %v3493_v43, %v1643_v59 }
 0x245   : > { %1882 = vst [vmem:[%s3451_s10 + $0xd8] sm:$0xff] %v1820_v51 }
 0x246   : > { %2253 = shalt.err (!%p2250_p3)
}
 0x247   : > { %s2254_s6 = scalar_lea.hbm %s3549_s27, 4608  ;;  %s2258_s9 = scalar_lea.hbm %s3602_s3, 9216 }
 0x248   : > { %p2255_p4 = scmp.ne.s32.totalorder %s3549_s27, %s2254_s6  ;;  %p2259_p9 = scmp.lt.u32.totalorder %s3549_s27, %s3602_s3 }
 0x249   : > { %p2260_p10 = scmp.lt.u32.totalorder %s2258_s9, %s2254_s6  ;;  %p2262_p12 = scmp.lt.u32.totalorder %s2254_s6, %s3549_s27 }
 0x24a   : > { %p2256_p7 = pnand %p2255_p4, %p2369_p5 }
 0x24b   : > { %p2261_p11 = por %p2260_p10, %p2259_p9 }
 0x24c   : > { %p2257_p8 = pneg %p2256_p7 }
 0x24d   : > { %p2263_p13 = por %p2262_p12, %p2261_p11 }
 0x24f   : > { %p2264_p0 = pnand %p2263_p13, %p2257_p8 }
 0x251   : > { %2267 = shalt.err (!%p2264_p0)
}
 0x252   : > { %s2309_s19 = smov 128   ;;  %s2310_s20 = smov 8  }
 0x253   : > { %2137 = dma.vmem_to_hbm [thread:$0]  (%p2369_p5), %s3551_s24, 4608, %s3549_s27, %s3558_s16, %s2309_s19, %s2309_s19, %s2310_s20  }
 0x254 PF: > { %p2143_p1 = scmp.ge.s32.totalorder %s2302_s15, 2  ;;  %s1920_s10 = sand.u32 1, %s2290_s12  }
 0x255   : > { %s1921_s11 = scalar_lea.sflag [#allocation3], %s1920_s10 }
 0x256   : > { %p2140_p2 = pnand %p2143_p1, %p2373_p6 }
 0x258   : > { %2285 = dma.done.wait (!%p2140_p2), %s1921_s11, 4608  }
 0x259   : > { %2287 = vsyncadd (!%p2140_p2), %s1921_s11, 4294962688  ;;  %p13_p3 = scmp.ge.s32.totalorder %s2356_s18, 4   ;;  %s3607_s12 = smov %s2294_s13 }
 0x25a   : > { %s3608_s13 = smov %s2298_s14  ;;  %s3609_s14 = smov %s2367_s21 }
 0x25b   : > { %s3610_s15 = smov %s2356_s18  ;;  %15 = sbr.rel (!%p13_p3) target bundleno = 3 (0x3), region = 67 }
 0x262   :  { %1926 = vsyncpa [#allocation3], 1 }
 0x263   :  { %1928 = vsyncpa [#allocation3 + $0x1], 1 }

</bundles_post_ra>
